<compile_context>
chip_gen: v6e
topology: v6e:2x2x1
jax: 0.10.0
libtpu: 0.0.40
codegen_flags: <defaults>
</compile_context>

<pallas_src>
import jax
import jax.numpy as jnp
from jax.experimental import pallas as pl
from jax.experimental.pallas import tpu as pltpu

HEAD_DIMS = [("id", 80), ("ex", 64), ("tex", 3), ("angles", 80),
             ("gamma", 27), ("t_xy", 2), ("t_z", 1)]
C_IN = 2048
C_OUT = sum(d for _, d in HEAD_DIMS)  # 257


def heads_kernel(x_ref, w_ref, b_ref, o_ref):
    # x_ref: [B, C_IN] bf16   w_ref: [C_IN, C_OUT] bf16
    # b_ref: [1, C_OUT] f32   o_ref: [B, C_OUT]    f32
    o_ref[...] = (
        jnp.dot(x_ref[...], w_ref[...], preferred_element_type=jnp.float32)
        + b_ref[...]
    )


def r_net_heads(feat_nchw, w_bf16, b_f32):
    """feat_nchw: [B, 2048, 1, 1] backbone features -> [B, 257] (f32).

    w_bf16: [2048, 257] bf16 fused head weights (pre-fused in init_params).
    b_f32 : [1, 257] f32 fused bias.
    """
    B = feat_nchw.shape[0]
    # 1x1 spatial squeezed; activations cast to bf16 (only ~4 KB/sample).
    x = feat_nchw.reshape(B, C_IN).astype(jnp.bfloat16)

    bytes_accessed = (
        B * C_IN * 2          # x (bf16)
        + C_IN * C_OUT * 2    # W (bf16) -- the dominant transfer
        + C_OUT * 4           # bias (f32)
        + B * C_OUT * 4       # output (f32)
    )
    cost = pl.CostEstimate(
        flops=2 * B * C_IN * C_OUT,
        transcendentals=0,
        bytes_accessed=bytes_accessed,
    )

    out = pl.pallas_call(
        heads_kernel,
        out_shape=jax.ShapeDtypeStruct((B, C_OUT), jnp.float32),
        grid_spec=pltpu.PrefetchScalarGridSpec(
            num_scalar_prefetch=0,
            grid=(1,),
            in_specs=[
                # Full-array block shapes: legal even when the last dims are
                # not multiples of (8, 128), and they avoid any padding DMA.
                pl.BlockSpec((B, C_IN), lambda i: (0, 0)),
                pl.BlockSpec((C_IN, C_OUT), lambda i: (0, 0)),
                pl.BlockSpec((1, C_OUT), lambda i: (0, 0)),
            ],
            out_specs=pl.BlockSpec((B, C_OUT), lambda i: (0, 0)),
        ),
        compiler_params=pltpu.CompilerParams(
            dimension_semantics=("arbitrary",)
        ),
        cost_estimate=cost,
    )(x, w_bf16, b_f32)

    return out


def init_params(key):
    """Deterministic per-head conv weights [C_out, 2048, 1, 1] + bias, fused.

    Fusion, transpose, and the bf16 cast are done here ONCE (hoisted out of
    the per-call path).
    Returns: w [2048, 257] bf16, b [1, 257] f32.
    """
    ws, bs = [], []
    for name, cout in HEAD_DIMS:
        key, kw, kb = jax.random.split(key, 3)
        # match nn.Conv2d default-ish scale (fan_in = 2048)
        bound = 1.0 / (C_IN ** 0.5)
        w = jax.random.uniform(kw, (cout, C_IN), jnp.float32, -bound, bound)
        b = jax.random.uniform(kb, (cout,), jnp.float32, -bound, bound)
        ws.append(w)
        bs.append(b)
    w_all = jnp.concatenate(ws, axis=0)                  # [257, 2048] f32
    b_all = jnp.concatenate(bs, axis=0)                  # [257] f32
    w_fused = w_all.T.astype(jnp.bfloat16)               # [2048, 257] bf16
    b_fused = b_all.reshape(1, C_OUT).astype(jnp.float32)  # [1, 257] f32
    return w_fused, b_fused


if __name__ == "__main__":
    key = jax.random.PRNGKey(0)
    key, kx = jax.random.split(key)

    # Small deterministic example: backbone feature map [B, 2048, 1, 1]
    B = 2
    feat = jax.random.normal(kx, (B, C_IN, 1, 1), jnp.float32)

    w_bf16, b_f32 = init_params(key)

    out = r_net_heads(feat, w_bf16, b_f32)
    out = jax.block_until_ready(out)
    assert out.shape == (B, C_OUT), out.shape
    assert out.dtype == jnp.float32, out.dtype

    # Reference matching the kernel's numerics: bf16 operands, f32 accumulate.
    x_bf16 = feat.reshape(B, C_IN).astype(jnp.bfloat16)
    ref = jnp.dot(x_bf16, w_bf16, preferred_element_type=jnp.float32) + b_f32
    assert jnp.allclose(out, ref, atol=2e-3, rtol=2e-3), (
        float(jnp.max(jnp.abs(out - ref))))

    # Loose sanity check against the full-f32 math (bf16 rounding only).
    w_f32 = w_bf16.astype(jnp.float32)
    ref_f32 = feat.reshape(B, C_IN) @ w_f32 + b_f32
    assert jnp.allclose(out, ref_f32, atol=5e-2, rtol=5e-2)

    print("KERNEL_OK")
</pallas_src>

<mosaic_0001>
module attributes {stable_mosaic.version = 11 : i64} {
  func.func @heads_kernel(%arg0: i32, %arg1: memref<2x2048xbf16, #tpu.memory_space<vmem>>, %arg2: memref<2048x257xbf16, #tpu.memory_space<vmem>>, %arg3: memref<1x257xf32, #tpu.memory_space<vmem>>, %arg4: memref<2x257xf32, #tpu.memory_space<vmem>>) attributes {dimension_semantics = [#tpu.dimension_semantics<arbitrary>], iteration_bounds = array<i64: 1>, scalar_prefetch = 0 : i64, scratch_operands = 0 : i64, tpu.core_type = #tpu.core_type<tc>, window_params = [{pipeline_mode = #tpu.pipeline_mode<synchronous>, transform_indices = @transform_0, window_bounds = array<i64: 2, 2048>}, {pipeline_mode = #tpu.pipeline_mode<synchronous>, transform_indices = @transform_1, window_bounds = array<i64: 2048, 257>}, {pipeline_mode = #tpu.pipeline_mode<synchronous>, transform_indices = @transform_2, window_bounds = array<i64: 1, 257>}, {pipeline_mode = #tpu.pipeline_mode<synchronous>, transform_indices = @transform_3, window_bounds = array<i64: 2, 257>}]} {
    %c0 = arith.constant 0 : index
    %c0_0 = arith.constant 0 : index
    %0 = vector.load %arg1[%c0, %c0_0] : memref<2x2048xbf16, #tpu.memory_space<vmem>>, vector<2x2048xbf16>
    %c0_1 = arith.constant 0 : index
    %c0_2 = arith.constant 0 : index
    %1 = vector.load %arg2[%c0_1, %c0_2] : memref<2048x257xbf16, #tpu.memory_space<vmem>>, vector<2048x257xbf16>
    %cst = arith.constant dense<0.000000e+00> : vector<2x257xf32>
    %2 = tpu.matmul %0, %1, %cst {dimension_numbers = #tpu.dot_dimension_numbers<[1], [0], [0], [1], [0, 0, 1, 1], [], []>} : vector<2x2048xbf16>, vector<2048x257xbf16>, vector<2x257xf32> -> vector<2x257xf32>
    %c0_3 = arith.constant 0 : index
    %c0_4 = arith.constant 0 : index
    %3 = vector.load %arg3[%c0_3, %c0_4] : memref<1x257xf32, #tpu.memory_space<vmem>>, vector<1x257xf32>
    %4 = vector.broadcast %3 : vector<1x257xf32> to vector<2x257xf32>
    %5 = arith.addf %2, %4 : vector<2x257xf32>
    %c0_5 = arith.constant 0 : index
    %c0_6 = arith.constant 0 : index
    %6 = vector.load %arg4[%c0_5, %c0_6] : memref<2x257xf32, #tpu.memory_space<vmem>>, vector<2x257xf32>
    tpu.vector_store %arg4[%c0_5, %c0_6], %5 {strides = array<i32>} : memref<2x257xf32, #tpu.memory_space<vmem>>, vector<2x257xf32>,
    return
  }
  func.func @transform_0(%arg0: i32) -> (i32, i32) {
    %c0_i32 = arith.constant 0 : i32
    %c0_i32_0 = arith.constant 0 : i32
    %c0_i32_1 = arith.constant 0 : i32
    return %c0_i32, %c0_i32_0 : i32, i32
  }
  func.func @transform_1(%arg0: i32) -> (i32, i32) {
    %c0_i32 = arith.constant 0 : i32
    %c0_i32_0 = arith.constant 0 : i32
    %c0_i32_1 = arith.constant 0 : i32
    return %c0_i32, %c0_i32_0 : i32, i32
  }
  func.func @transform_2(%arg0: i32) -> (i32, i32) {
    %c0_i32 = arith.constant 0 : i32
    %c0_i32_0 = arith.constant 0 : i32
    %c0_i32_1 = arith.constant 0 : i32
    return %c0_i32, %c0_i32_0 : i32, i32
  }
  func.func @transform_3(%arg0: i32) -> (i32, i32) {
    %c0_i32 = arith.constant 0 : i32
    %c0_i32_0 = arith.constant 0 : i32
    %c0_i32_1 = arith.constant 0 : i32
    return %c0_i32, %c0_i32_0 : i32, i32
  }
}

</mosaic_0001>

<bundles_post_ra>
// kernel: tpu_custom_call.1
= control target key start
LH: loop header
LB: loop body
LE: loop exit
PB: predicated region body
PF: predicated region fallthrough
CT: control target
= control target key end

     0   :  { %v532_v36 = vlaneseq  ;;  %v4498_v37 = vmov 1966171168   ;;  %s5833_s0 = inlined_call_operand.vmem [shape: bf16[2,2048], index: 0, kind: input, shape index: {}]   ;;  %s5834_s1 = inlined_call_operand.vmem [shape: bf16[2048,257], index: 1, kind: input, shape index: {}]   ;;  %s5835_s2 = inlined_call_operand.vmem [shape: f32[1,257], index: 2, kind: input, shape index: {}]   ;;  %s5836_s3 = inlined_call_operand.hbm [shape: f32[2,257], index: 3, kind: output, shape index: {}]  }
   0x1   :  { %v3962_v0 = vld [vmem:[%s5834_s1 + $0xac] ss:$12 sps:$4 sm:$0xff]   ;;  %v3966_v2 = vld [vmem:[%s5834_s1 + $0xa8] ss:$12 sps:$4 sm:$0xff]   ;;  %v3972_v6 = vld [vmem:[%s5834_s1 + $0x90] ss:$12 sps:$4 sm:$0xff]   ;;  %v551_v38 = vunpack.c.l.s4 %v4498_v37 }
   0x2   :  { %v3964_v1 = vld [vmem:[%s5834_s1 + $0x22c] ss:$12 sps:$4 sm:$0xff]   ;;  %2711 = vmatprep.subr.bf16.mxu0 %v3962_v0  ;;  %v3967_v3 = vld [vmem:[%s5834_s1 + $0x228] ss:$12 sps:$4 sm:$0xff]   ;;  %v3973_v7 = vld [vmem:[%s5834_s1 + $0x210] ss:$12 sps:$4 sm:$0xff]  }
   0x3   :  { %2752 = vmatprep.subr.bf16.mxu1 %v3964_v1  ;;  %v3968_v4 = vld [vmem:[%s5834_s1 + $0x94] ss:$12 sps:$4 sm:$0xff]   ;;  %2712 = vmatpush1.bf16.msra.mxu0 %v3966_v2  ;;  %v3974_v8 = vld [vmem:[%s5834_s1 + $0x7c] ss:$12 sps:$4 sm:$0xff]   ;;  %v3978_v10 = vld [vmem:[%s5834_s1 + $0x78] ss:$12 sps:$4 sm:$0xff]   ;;  %v552_v43 = vunpack.c.0.s8 %v551_v38 }
   0x4   :  { %2753 = vmatpush1.bf16.msra.mxu1 %v3967_v3  ;;  %v3970_v5 = vld [vmem:[%s5834_s1 + $0x214] ss:$12 sps:$4 sm:$0xff]   ;;  %2713 = vmatprep.subr.bf16.mxu0 %v3968_v4  ;;  %v3976_v9 = vld [vmem:[%s5834_s1 + $0x1fc] ss:$12 sps:$4 sm:$0xff]   ;;  %v3979_v11 = vld [vmem:[%s5834_s1 + $0x1f8] ss:$12 sps:$4 sm:$0xff]  }
   0x5   :  { %2754 = vmatprep.subr.bf16.mxu1 %v3970_v5  ;;  %v3980_v12 = vld [vmem:[%s5834_s1 + $0x64] ss:$12 sps:$4 sm:$0xff]   ;;  %v3984_v14 = vld [vmem:[%s5834_s1 + $0x60] ss:$12 sps:$4 sm:$0xff]   ;;  %v3990_v18 = vld [vmem:[%s5834_s1 + $0x48] ss:$12 sps:$4 sm:$0xff]  }
   0x6   :  { %v3982_v13 = vld [vmem:[%s5834_s1 + $0x1e4] ss:$12 sps:$4 sm:$0xff]   ;;  %v3985_v15 = vld [vmem:[%s5834_s1 + $0x1e0] ss:$12 sps:$4 sm:$0xff]   ;;  %v3991_v19 = vld [vmem:[%s5834_s1 + $0x1c8] ss:$12 sps:$4 sm:$0xff]  }
   0x7   :  { %2714 = vmatpush1.bf16.msra.mxu0 %v3972_v6  ;;  %v3986_v16 = vld [vmem:[%s5834_s1 + $0x4c] ss:$12 sps:$4 sm:$0xff]   ;;  %v3992_v20 = vld [vmem:[%s5834_s1 + $0x34] ss:$12 sps:$4 sm:$0xff]   ;;  %v3996_v22 = vld [vmem:[%s5834_s1 + $0x30] ss:$12 sps:$4 sm:$0xff]  }
   0x8   :  { %2755 = vmatpush1.bf16.msra.mxu1 %v3973_v7  ;;  %2715 = vmatprep.subr.bf16.mxu0 %v3974_v8  ;;  %v3988_v17 = vld [vmem:[%s5834_s1 + $0x1cc] ss:$12 sps:$4 sm:$0xff]   ;;  %v3994_v21 = vld [vmem:[%s5834_s1 + $0x1b4] ss:$12 sps:$4 sm:$0xff]   ;;  %v3997_v23 = vld [vmem:[%s5834_s1 + $0x1b0] ss:$12 sps:$4 sm:$0xff]  }
   0x9   :  { %2756 = vmatprep.subr.bf16.mxu1 %v3976_v9  ;;  %v3998_v24 = vld [vmem:[%s5834_s1 + $0x1c] ss:$12 sps:$4 sm:$0xff]   ;;  %v4002_v26 = vld [vmem:[%s5834_s1 + $0x18] ss:$12 sps:$4 sm:$0xff]   ;;  %v4008_v30 = vld [vmem:[%s5834_s1] ss:$12 sps:$4 sm:$0xff]  }
   0xa   :  { %v4000_v25 = vld [vmem:[%s5834_s1 + $0x19c] ss:$12 sps:$4 sm:$0xff]   ;;  %v4003_v27 = vld [vmem:[%s5834_s1 + $0x198] ss:$12 sps:$4 sm:$0xff]   ;;  %v4009_v31 = vld [vmem:[%s5834_s1 + $0x180] ss:$12 sps:$4 sm:$0xff]  }
   0xb   :  { %2716 = vmatpush1.bf16.msra.mxu0 %v3978_v10  ;;  %v4004_v28 = vld [vmem:[%s5834_s1 + $0x4] ss:$12 sps:$4 sm:$0xff]   ;;  %v4010_v32 = vld [vmem:[%s5834_s1 + $0x16c] ss:$12 sps:$4 sm:$0xff]   ;;  %v4014_v34 = vld [vmem:[%s5834_s1 + $0x168] ss:$12 sps:$4 sm:$0xff]  }
   0xc   :  { %2757 = vmatpush1.bf16.msra.mxu1 %v3979_v11  ;;  %2717 = vmatprep.subr.bf16.mxu0 %v3980_v12  ;;  %v4006_v29 = vld [vmem:[%s5834_s1 + $0x184] ss:$12 sps:$4 sm:$0xff]   ;;  %v4012_v33 = vld [vmem:[%s5834_s1 + $0x2ec] ss:$12 sps:$4 sm:$0xff]   ;;  %v4015_v35 = vld [vmem:[%s5834_s1 + $0x2e8] ss:$12 sps:$4 sm:$0xff]  }
   0xd   :  { %2758 = vmatprep.subr.bf16.mxu1 %v3982_v13  ;;  %v4016_v39 = vld [vmem:[%s5834_s1 + $0x154] ss:$12 sps:$4 sm:$0xff]   ;;  %v4020_v41 = vld [vmem:[%s5834_s1 + $0x150] ss:$12 sps:$4 sm:$0xff]   ;;  %v4638_v42 = vshrl.u32 %v532_v36, 7 }
   0xe   :  { %v4018_v40 = vld [vmem:[%s5834_s1 + $0x2d4] ss:$12 sps:$4 sm:$0xff]   ;;  %v4021_v44 = vld [vmem:[%s5834_s1 + $0x2d0] ss:$12 sps:$4 sm:$0xff]   ;;  %v4026_v47 = vld [vmem:[%s5834_s1 + $0x138] ss:$12 sps:$4 sm:$0xff]  }
   0xf   :  { %2718 = vmatpush1.bf16.msra.mxu0 %v3984_v14  ;;  %v4022_v45 = vld [vmem:[%s5834_s1 + $0x13c] ss:$12 sps:$4 sm:$0xff]   ;;  %v4027_v48 = vld [vmem:[%s5834_s1 + $0x2b8] ss:$12 sps:$4 sm:$0xff]   ;;  %v4656_v49 = vsub.s32 %v552_v43, %v4638_v42  ;;  %v4032_v53 = vld [vmem:[%s5834_s1 + $0x120] ss:$12 sps:$4 sm:$0xff]  }
  0x10   :  { %2759 = vmatpush1.bf16.msra.mxu1 %v3985_v15  ;;  %2719 = vmatprep.subr.bf16.mxu0 %v3986_v16  ;;  %v4024_v46 = vld [vmem:[%s5834_s1 + $0x2bc] ss:$12 sps:$4 sm:$0xff]   ;;  %v4028_v50 = vld [vmem:[%s5834_s1 + $0x124] ss:$12 sps:$4 sm:$0xff]   ;;  %v4033_v55 = vld [vmem:[%s5834_s1 + $0x2a0] ss:$12 sps:$4 sm:$0xff]  }
  0x11   :  { %2760 = vmatprep.subr.bf16.mxu1 %v3988_v17  ;;  %v4030_v51 = vld [vmem:[%s5834_s1 + $0x2a4] ss:$12 sps:$4 sm:$0xff]   ;;  %v4034_v56 = vld [vmem:[%s5834_s1 + $0x10c] ss:$12 sps:$4 sm:$0xff]   ;;  %v4038_v59 = vld [vmem:[%s5834_s1 + $0x108] ss:$12 sps:$4 sm:$0xff]  }
  0x12   :  { %v16_v52 = vld [vmem:[%s5833_s0] sm:$0xff]  ;;  %v4036_v57 = vld [vmem:[%s5834_s1 + $0x28c] ss:$12 sps:$4 sm:$0xff]   ;;  %v4039_v61 = vld [vmem:[%s5834_s1 + $0x288] ss:$12 sps:$4 sm:$0xff]  }
  0x13   :  { %2720 = vmatpush1.bf16.msra.mxu0 %v3990_v18  ;;  %v556_v54 = vrot.slane %v16_v52, %v4656_v49  ;;  %v4040_v62 = vld [vmem:[%s5834_s1 + $0xf4] ss:$12 sps:$4 sm:$0xff]   ;;  %v549_v1 = vcombine.high %v16_v52, %v16_v52  ;;  %v4044_v2 = vld [vmem:[%s5834_s1 + $0xf0] ss:$12 sps:$4 sm:$0xff]   ;;  %v4050_v7 = vld [vmem:[%s5834_s1 + $0xd8] ss:$12 sps:$4 sm:$0xff]  }
  0x14   :  { %2761 = vmatpush1.bf16.msra.mxu1 %v3991_v19  ;;  %2721 = vmatprep.subr.bf16.mxu0 %v3992_v20  ;;  %v4042_v63 = vld [vmem:[%s5834_s1 + $0x274] ss:$12 sps:$4 sm:$0xff]   ;;  %v4045_v3 = vld [vmem:[%s5834_s1 + $0x270] ss:$12 sps:$4 sm:$0xff]   ;;  %v4051_v8 = vld [vmem:[%s5834_s1 + $0x258] ss:$12 sps:$4 sm:$0xff]  }
  0x15   :  { %2762 = vmatprep.subr.bf16.mxu1 %v3994_v21  ;;  %v564_v58 = vcombine.high %v556_v54, %v556_v54  ;;  %v4046_v4 = vld [vmem:[%s5834_s1 + $0xdc] ss:$12 sps:$4 sm:$0xff]   ;;  %v4714_v6 = vrot.slane %v549_v1, %v4656_v49  ;;  %v4052_v9 = vld [vmem:[%s5834_s1 + $0xc4] ss:$12 sps:$4 sm:$0xff]   ;;  %v4056_v12 = vld [vmem:[%s5834_s1 + $0xc0] ss:$12 sps:$4 sm:$0xff]   ;;  %v4734_v13 = vrot.slane %v556_v54, %v4656_v49 }
  0x16   :  { %v4048_v5 = vld [vmem:[%s5834_s1 + $0x25c] ss:$12 sps:$4 sm:$0xff]   ;;  %v4054_v10 = vld [vmem:[%s5834_s1 + $0x244] ss:$12 sps:$4 sm:$0xff]   ;;  %v4057_v14 = vld [vmem:[%s5834_s1 + $0x240] ss:$12 sps:$4 sm:$0xff]  }
  0x17   :  { %2722 = vmatpush1.bf16.msra.mxu0 %v3996_v22  ;;  %v4684_v60 = vrot.slane %v564_v58, %v4656_v49  ;;  %v565_v11 = vcombine.high %v4714_v6, %v4714_v6  ;;  %v4060_v15 = vld [vmem:[%s5834_s1 + $0x3ac] ss:$12 sps:$4 sm:$0xff]   ;;  %v4750_v18 = vcombine.high %v4734_v13, %v4734_v13  ;;  %v4058_v19 = vld [vmem:[%s5834_s1 + $0x3a8] ss:$12 sps:$4 sm:$0xff]   ;;  %v4112_v58 = vld [vmem:[%s5834_s1 + $0x450] ss:$12 sps:$4 sm:$0xff]  }
  0x18   :  { %2763 = vmatpush1.bf16.msra.mxu1 %v3997_v23  ;;  %2723 = vmatprep.subr.bf16.mxu0 %v3998_v24  ;;  %v4063_v16 = vld [vmem:[%s5834_s1 + $0x52c] ss:$12 sps:$4 sm:$0xff]   ;;  %v4061_v20 = vld [vmem:[%s5834_s1 + $0x528] ss:$12 sps:$4 sm:$0xff]   ;;  %v4064_v24 = vld [vmem:[%s5834_s1 + $0x390] ss:$12 sps:$4 sm:$0xff]  }
  0x19   :  { %2764 = vmatprep.subr.bf16.mxu1 %v4000_v25  ;;  %v4697_v0 = vcombine.high %v4684_v60, %v4684_v60  ;;  %2743 = vmatprep.mubr.bf16.mxu0 %v4684_v60  ;;  %v4746_v17 = vrot.slane %v565_v11, %v4656_v49  ;;  %v4066_v21 = vld [vmem:[%s5834_s1 + $0x394] ss:$12 sps:$4 sm:$0xff]   ;;  %v4067_v25 = vld [vmem:[%s5834_s1 + $0x510] ss:$12 sps:$4 sm:$0xff]   ;;  %v4108_v52 = vld [vmem:[%s5834_s1 + $0x46c] ss:$12 sps:$4 sm:$0xff]  }
  0x1a   :  { %v4069_v22 = vld [vmem:[%s5834_s1 + $0x514] ss:$12 sps:$4 sm:$0xff]   ;;  %v4096_v43 = vld [vmem:[%s5834_s1 + $0x31c] ss:$12 sps:$4 sm:$0xff]   ;;  %v4121_v1 = vld [vmem:[%s5834_s1 + $0x5b8] ss:$12 sps:$4 sm:$0xff]  }
  0x1b   :  { %2724 = vmatpush1.bf16.msra.mxu0 %v4002_v26  ;;  %2784 = vmatprep.mubr.bf16.mxu1 %v4697_v0  ;;  %v4766_v23 = vcombine.high %v4746_v17, %v4746_v17  ;;  %v4072_v26 = vld [vmem:[%s5834_s1 + $0x37c] ss:$12 sps:$4 sm:$0xff]   ;;  %v4090_v38 = vld [vmem:[%s5834_s1 + $0x334] ss:$12 sps:$4 sm:$0xff]  }
  0x1c   :  { %2765 = vmatpush1.bf16.msra.mxu1 %v4003_v27  ;;  %2725 = vmatprep.subr.bf16.mxu0 %v4004_v28  ;;  %v4075_v27 = vld [vmem:[%s5834_s1 + $0x4fc] ss:$12 sps:$4 sm:$0xff]   ;;  %v4070_v28 = vld [vmem:[%s5834_s1 + $0x378] ss:$12 sps:$4 sm:$0xff]   ;;  %v4138_v11 = vld [vmem:[%s5834_s1 + $0x3f4] ss:$12 sps:$4 sm:$0xff]  }
  0x1d   :  { %2766 = vmatprep.subr.bf16.mxu1 %v4006_v29  ;;  %v4073_v29 = vld [vmem:[%s5834_s1 + $0x4f8] ss:$12 sps:$4 sm:$0xff]   ;;  %v4082_v36 = vld [vmem:[%s5834_s1 + $0x348] ss:$12 sps:$4 sm:$0xff]  }
  0x1e   :  { %v4085_v37 = vld [vmem:[%s5834_s1 + $0x4c8] ss:$12 sps:$4 sm:$0xff]  }
  0x1f   :  { %2726 = vmatpush1.bf16.msra.mxu0 %v4008_v30  ;;  %v4078_v30 = vld [vmem:[%s5834_s1 + $0x364] ss:$12 sps:$4 sm:$0xff]   ;;  %v4106_v54 = vld [vmem:[%s5834_s1 + $0x468] ss:$12 sps:$4 sm:$0xff]  }
  0x20   :  { %2767 = vmatpush1.bf16.msra.mxu1 %v4009_v31  ;;  %2727 = vmatprep.subr.bf16.mxu0 %v4010_v32  ;;  %v4081_v31 = vld [vmem:[%s5834_s1 + $0x4e4] ss:$12 sps:$4 sm:$0xff]   ;;  %v4076_v32 = vld [vmem:[%s5834_s1 + $0x360] ss:$12 sps:$4 sm:$0xff]  }
  0x21   :  { %2768 = vmatprep.subr.bf16.mxu1 %v4012_v33  ;;  %v4079_v33 = vld [vmem:[%s5834_s1 + $0x4e0] ss:$12 sps:$4 sm:$0xff]  }
  0x23   :  { %2728 = vmatpush2.bf16.msra.mxu0 %v4014_v34  ;;  %v4084_v34 = vld [vmem:[%s5834_s1 + $0x34c] ss:$12 sps:$4 sm:$0xff]  }
  0x24   :  { %2769 = vmatpush2.bf16.msra.mxu1 %v4015_v35  ;;  %2729 = vmatprep.subr.bf16.mxu0 %v4016_v39  ;;  %v4087_v35 = vld [vmem:[%s5834_s1 + $0x4cc] ss:$12 sps:$4 sm:$0xff]   ;;  %v4093_v39 = vld [vmem:[%s5834_s1 + $0x4b4] ss:$12 sps:$4 sm:$0xff]  }
  0x25   :  { %2770 = vmatprep.subr.bf16.mxu1 %v4018_v40  ;;  %v4088_v40 = vld [vmem:[%s5834_s1 + $0x330] ss:$12 sps:$4 sm:$0xff]  }
  0x27   :  { %2730 = vmatpush2.bf16.msra.mxu0 %v4020_v41  ;;  %v4091_v41 = vld [vmem:[%s5834_s1 + $0x4b0] ss:$12 sps:$4 sm:$0xff]  }
  0x28   :  { %2771 = vmatpush2.bf16.msra.mxu1 %v4021_v44  ;;  %2731 = vmatprep.subr.bf16.mxu0 %v4022_v45  ;;  %v4099_v44 = vld [vmem:[%s5834_s1 + $0x49c] ss:$12 sps:$4 sm:$0xff]   ;;  %v4094_v45 = vld [vmem:[%s5834_s1 + $0x318] ss:$12 sps:$4 sm:$0xff]  }
  0x29   :  { %2772 = vmatprep.subr.bf16.mxu1 %v4024_v46  ;;  %v4097_v46 = vld [vmem:[%s5834_s1 + $0x498] ss:$12 sps:$4 sm:$0xff]  }
  0x2b   :  { %2732 = vmatpush2.bf16.msra.mxu0 %v4026_v47  ;;  %v4102_v47 = vld [vmem:[%s5834_s1 + $0x304] ss:$12 sps:$4 sm:$0xff]  }
  0x2c   :  { %2773 = vmatpush2.bf16.msra.mxu1 %v4027_v48  ;;  %2733 = vmatprep.subr.bf16.mxu0 %v4028_v50  ;;  %v4105_v48 = vld [vmem:[%s5834_s1 + $0x484] ss:$12 sps:$4 sm:$0xff]   ;;  %v4100_v50 = vld [vmem:[%s5834_s1 + $0x300] ss:$12 sps:$4 sm:$0xff]  }
  0x2d   :  { %2774 = vmatprep.subr.bf16.mxu1 %v4030_v51  ;;  %v4103_v51 = vld [vmem:[%s5834_s1 + $0x480] ss:$12 sps:$4 sm:$0xff]  }
  0x2f   :  { %2734 = vmatpush2.bf16.msra.mxu0 %v4032_v53  ;;  %v4111_v53 = vld [vmem:[%s5834_s1 + $0x5ec] ss:$12 sps:$4 sm:$0xff]  }
  0x30   :  { %2775 = vmatpush2.bf16.msra.mxu1 %v4033_v55  ;;  %2735 = vmatprep.subr.bf16.mxu0 %v4034_v56  ;;  %v4109_v55 = vld [vmem:[%s5834_s1 + $0x5e8] ss:$12 sps:$4 sm:$0xff]  }
  0x31   :  { %2776 = vmatprep.subr.bf16.mxu1 %v4036_v57  ;;  %v4114_v56 = vld [vmem:[%s5834_s1 + $0x454] ss:$12 sps:$4 sm:$0xff]  }
  0x32   :  { %v4117_v57 = vld [vmem:[%s5834_s1 + $0x5d4] ss:$12 sps:$4 sm:$0xff]  }
  0x33   :  { %2736 = vmatpush2.bf16.msra.mxu0 %v4038_v59  ;;  %v4115_v59 = vld [vmem:[%s5834_s1 + $0x5d0] ss:$12 sps:$4 sm:$0xff]  }
  0x34   :  { %2777 = vmatpush2.bf16.msra.mxu1 %v4039_v61  ;;  %2737 = vmatprep.subr.bf16.mxu0 %v4040_v62  ;;  %v4120_v61 = vld [vmem:[%s5834_s1 + $0x43c] ss:$12 sps:$4 sm:$0xff]  }
  0x35   :  { %2778 = vmatprep.subr.bf16.mxu1 %v4042_v63  ;;  %v4123_v62 = vld [vmem:[%s5834_s1 + $0x5bc] ss:$12 sps:$4 sm:$0xff]   ;;  %v4118_v63 = vld [vmem:[%s5834_s1 + $0x438] ss:$12 sps:$4 sm:$0xff]  }
  0x37   :  { %2738 = vmatpush2.bf16.msra.mxu0 %v4044_v2  ;;  %v4126_v2 = vld [vmem:[%s5834_s1 + $0x424] ss:$12 sps:$4 sm:$0xff]  }
  0x38   :  { %2779 = vmatpush2.bf16.msra.mxu1 %v4045_v3  ;;  %2739 = vmatprep.subr.bf16.mxu0 %v4046_v4  ;;  %v4129_v3 = vld [vmem:[%s5834_s1 + $0x5a4] ss:$12 sps:$4 sm:$0xff]   ;;  %v4124_v4 = vld [vmem:[%s5834_s1 + $0x420] ss:$12 sps:$4 sm:$0xff]  }
  0x39   :  { %2780 = vmatprep.subr.bf16.mxu1 %v4048_v5  ;;  %v4127_v5 = vld [vmem:[%s5834_s1 + $0x5a0] ss:$12 sps:$4 sm:$0xff]  }
  0x3b   :  { %2740 = vmatpush2.bf16.msra.mxu0 %v4050_v7  ;;  %v4132_v7 = vld [vmem:[%s5834_s1 + $0x40c] ss:$12 sps:$4 sm:$0xff]  }
  0x3c   :  { %2781 = vmatpush2.bf16.msra.mxu1 %v4051_v8  ;;  %2741 = vmatprep.subr.bf16.mxu0 %v4052_v9  ;;  %v4135_v8 = vld [vmem:[%s5834_s1 + $0x58c] ss:$12 sps:$4 sm:$0xff]   ;;  %v4130_v9 = vld [vmem:[%s5834_s1 + $0x408] ss:$12 sps:$4 sm:$0xff]  }
  0x3d   :  { %2782 = vmatprep.subr.bf16.mxu1 %v4054_v10  ;;  %v4133_v10 = vld [vmem:[%s5834_s1 + $0x588] ss:$12 sps:$4 sm:$0xff]  }
  0x3f   :  { %2742 = vmatpush2.bf16.msra.mxu0 %v4056_v12  ;;  %v4141_v12 = vld [vmem:[%s5834_s1 + $0x574] ss:$12 sps:$4 sm:$0xff]  }
  0x40   :  { %2783 = vmatpush2.bf16.msra.mxu1 %v4057_v14  ;;  %2793 = vmatprep.subr.bf16.mxu0 %v4060_v15  ;;  %v4136_v14 = vld [vmem:[%s5834_s1 + $0x3f0] ss:$12 sps:$4 sm:$0xff]  }
  0x41   :  { %2834 = vmatprep.subr.bf16.mxu1 %v4063_v16  ;;  %v4139_v15 = vld [vmem:[%s5834_s1 + $0x570] ss:$12 sps:$4 sm:$0xff]  }
  0x42   :  { %2744 = vmatmul.mubr.bf16.vlgmr.msra.gmra.mxu0 %v4734_v13  ;;  %v4144_v16 = vld [vmem:[%s5834_s1 + $0x3dc] ss:$12 sps:$4 sm:$0xff]  }
  0x43   :  { %2785 = vmatmul.mubr.bf16.vlgmr.msra.gmra.mxu1 %v4750_v18  ;;  %2794 = vmatpush1.bf16.msra.mxu0 %v4058_v19  ;;  %v4147_v19 = vld [vmem:[%s5834_s1 + $0x55c] ss:$12 sps:$4 sm:$0xff]  }
  0x44   :  { %2835 = vmatpush1.bf16.msra.mxu1 %v4061_v20  ;;  %2795 = vmatprep.subr.bf16.mxu0 %v4066_v21  ;;  %v4142_v20 = vld [vmem:[%s5834_s1 + $0x3d8] ss:$12 sps:$4 sm:$0xff]  }
  0x45   :  { %2836 = vmatprep.subr.bf16.mxu1 %v4069_v22  ;;  %2825 = vmatprep.mubr.bf16.mxu0 %v4746_v17  ;;  %v4145_v21 = vld [vmem:[%s5834_s1 + $0x558] ss:$12 sps:$4 sm:$0xff]  }
  0x46   :  { %2866 = vmatprep.mubr.bf16.mxu1 %v4766_v23  ;;  %v4150_v22 = vld [vmem:[%s5834_s1 + $0x3c4] ss:$12 sps:$4 sm:$0xff]  }
  0x47   :  { %2796 = vmatpush1.bf16.msra.mxu0 %v4064_v24  ;;  %v4153_v24 = vld [vmem:[%s5834_s1 + $0x544] ss:$12 sps:$4 sm:$0xff]  }
  0x48   :  { %2837 = vmatpush1.bf16.msra.mxu1 %v4067_v25  ;;  %2797 = vmatprep.subr.bf16.mxu0 %v4072_v26  ;;  %v4148_v25 = vld [vmem:[%s5834_s1 + $0x3c0] ss:$12 sps:$4 sm:$0xff]   ;;  %v4945_v26 = vrot.slane %v4714_v6, %v4656_v49 }
  0x49   :  { %2838 = vmatprep.subr.bf16.mxu1 %v4075_v27  ;;  %v4151_v27 = vld [vmem:[%s5834_s1 + $0x540] ss:$12 sps:$4 sm:$0xff]  }
  0x4a   :  { %v4958_v6 = vcombine.high %v4945_v26, %v4945_v26 }
  0x4b   :  { %2798 = vmatpush1.bf16.msra.mxu0 %v4070_v28  ;;  %v4157_v28 = vld [vmem:[%s5834_s1 + $0x6ac] ss:$12 sps:$4 sm:$0xff]  }
  0x4c   :  { %2839 = vmatpush1.bf16.msra.mxu1 %v4073_v29  ;;  %2799 = vmatprep.subr.bf16.mxu0 %v4078_v30  ;;  %v4160_v29 = vld [vmem:[%s5834_s1 + $0x82c] ss:$12 sps:$4 sm:$0xff]   ;;  %v4155_v30 = vld [vmem:[%s5834_s1 + $0x6a8] ss:$12 sps:$4 sm:$0xff]  }
  0x4d   :  { %2840 = vmatprep.subr.bf16.mxu1 %v4081_v31  ;;  %v4158_v31 = vld [vmem:[%s5834_s1 + $0x828] ss:$12 sps:$4 sm:$0xff]  }
  0x4f   :  { %2800 = vmatpush1.bf16.msra.mxu0 %v4076_v32  ;;  %v4969_v32 = vld [vmem:[%s5833_s0 + $0x8] sm:$0xff] }
  0x50   :  { %2841 = vmatpush1.bf16.msra.mxu1 %v4079_v33  ;;  %2801 = vmatprep.subr.bf16.mxu0 %v4084_v34  ;;  %v4163_v33 = vld [vmem:[%s5834_s1 + $0x694] ss:$12 sps:$4 sm:$0xff]  }
  0x51   :  { %2842 = vmatprep.subr.bf16.mxu1 %v4087_v35  ;;  %v4166_v34 = vld [vmem:[%s5834_s1 + $0x814] ss:$12 sps:$4 sm:$0xff]   ;;  %v4979_v35 = vrot.slane %v4969_v32, %v4656_v49 }
  0x53   :  { %2802 = vmatpush1.bf16.msra.mxu0 %v4082_v36  ;;  %v613_v36 = vcombine.high %v4979_v35, %v4979_v35 }
  0x54   :  { %2843 = vmatpush1.bf16.msra.mxu1 %v4085_v37  ;;  %2803 = vmatprep.subr.bf16.mxu0 %v4090_v38  ;;  %v4161_v37 = vld [vmem:[%s5834_s1 + $0x690] ss:$12 sps:$4 sm:$0xff]  }
  0x55   :  { %2844 = vmatprep.subr.bf16.mxu1 %v4093_v39  ;;  %v4164_v38 = vld [vmem:[%s5834_s1 + $0x810] ss:$12 sps:$4 sm:$0xff]  }
  0x56   :  { %v4169_v39 = vld [vmem:[%s5834_s1 + $0x67c] ss:$12 sps:$4 sm:$0xff]  }
  0x57   :  { %2804 = vmatpush1.bf16.msra.mxu0 %v4088_v40  ;;  %v4172_v40 = vld [vmem:[%s5834_s1 + $0x7fc] ss:$12 sps:$4 sm:$0xff]  }
  0x58   :  { %2845 = vmatpush1.bf16.msra.mxu1 %v4091_v41  ;;  %2805 = vmatprep.subr.bf16.mxu0 %v4096_v43  ;;  %v4998_v41 = vrot.slane %v613_v36, %v4656_v49  ;;  %v598_v36 = vcombine.high %v4969_v32, %v4969_v32  ;;  %v4239_v32 = vld [vmem:[%s5834_s1 + $0x6d8] ss:$12 sps:$4 sm:$0xff]  }
  0x59   :  { %2846 = vmatprep.subr.bf16.mxu1 %v4099_v44  ;;  %v4167_v44 = vld [vmem:[%s5834_s1 + $0x678] ss:$12 sps:$4 sm:$0xff]  }
  0x5a   :  { %v5003_v43 = vcombine.high %v4998_v41, %v4998_v41 }
  0x5b   :  { %2806 = vmatpush1.bf16.msra.mxu0 %v4094_v45  ;;  %v4170_v45 = vld [vmem:[%s5834_s1 + $0x7f8] ss:$12 sps:$4 sm:$0xff]  }
  0x5c   :  { %2847 = vmatpush1.bf16.msra.mxu1 %v4097_v46  ;;  %2807 = vmatprep.subr.bf16.mxu0 %v4102_v47  ;;  %v4175_v46 = vld [vmem:[%s5834_s1 + $0x664] ss:$12 sps:$4 sm:$0xff]  }
  0x5d   :  { %2848 = vmatprep.subr.bf16.mxu1 %v4105_v48  ;;  %v4178_v47 = vld [vmem:[%s5834_s1 + $0x7e4] ss:$12 sps:$4 sm:$0xff]   ;;  %v4173_v48 = vld [vmem:[%s5834_s1 + $0x660] ss:$12 sps:$4 sm:$0xff]  }
  0x5f   :  { %2808 = vmatpush1.bf16.msra.mxu0 %v4100_v50  ;;  %v4176_v50 = vld [vmem:[%s5834_s1 + $0x7e0] ss:$12 sps:$4 sm:$0xff]  }
  0x60   :  { %2849 = vmatpush1.bf16.msra.mxu1 %v4103_v51  ;;  %2809 = vmatprep.subr.bf16.mxu0 %v4108_v52  ;;  %v4181_v51 = vld [vmem:[%s5834_s1 + $0x64c] ss:$12 sps:$4 sm:$0xff]  }
  0x61   :  { %2850 = vmatprep.subr.bf16.mxu1 %v4111_v53  ;;  %v4184_v52 = vld [vmem:[%s5834_s1 + $0x7cc] ss:$12 sps:$4 sm:$0xff]   ;;  %v4179_v53 = vld [vmem:[%s5834_s1 + $0x648] ss:$12 sps:$4 sm:$0xff]  }
  0x63   :  { %2810 = vmatpush2.bf16.msra.mxu0 %v4106_v54  ;;  %v4182_v54 = vld [vmem:[%s5834_s1 + $0x7c8] ss:$12 sps:$4 sm:$0xff]  }
  0x64   :  { %2851 = vmatpush2.bf16.msra.mxu1 %v4109_v55  ;;  %2811 = vmatprep.subr.bf16.mxu0 %v4114_v56  ;;  %v4187_v55 = vld [vmem:[%s5834_s1 + $0x634] ss:$12 sps:$4 sm:$0xff]  }
  0x65   :  { %2852 = vmatprep.subr.bf16.mxu1 %v4117_v57  ;;  %v4190_v56 = vld [vmem:[%s5834_s1 + $0x7b4] ss:$12 sps:$4 sm:$0xff]   ;;  %v4185_v57 = vld [vmem:[%s5834_s1 + $0x630] ss:$12 sps:$4 sm:$0xff]  }
  0x67   :  { %2812 = vmatpush2.bf16.msra.mxu0 %v4112_v58  ;;  %v4188_v58 = vld [vmem:[%s5834_s1 + $0x7b0] ss:$12 sps:$4 sm:$0xff]  }
  0x68   :  { %2853 = vmatpush2.bf16.msra.mxu1 %v4115_v59  ;;  %2813 = vmatprep.subr.bf16.mxu0 %v4120_v61  ;;  %v4193_v59 = vld [vmem:[%s5834_s1 + $0x61c] ss:$12 sps:$4 sm:$0xff]  }
  0x69   :  { %2854 = vmatprep.subr.bf16.mxu1 %v4123_v62  ;;  %v4196_v61 = vld [vmem:[%s5834_s1 + $0x79c] ss:$12 sps:$4 sm:$0xff]   ;;  %v4191_v62 = vld [vmem:[%s5834_s1 + $0x618] ss:$12 sps:$4 sm:$0xff]  }
  0x6b   :  { %2814 = vmatpush2.bf16.msra.mxu0 %v4118_v63  ;;  %v4194_v63 = vld [vmem:[%s5834_s1 + $0x798] ss:$12 sps:$4 sm:$0xff]  }
  0x6c   :  { %2855 = vmatpush2.bf16.msra.mxu1 %v4121_v1  ;;  %2815 = vmatprep.subr.bf16.mxu0 %v4126_v2  ;;  %v4199_v1 = vld [vmem:[%s5834_s1 + $0x604] ss:$12 sps:$4 sm:$0xff]  }
  0x6d   :  { %2856 = vmatprep.subr.bf16.mxu1 %v4129_v3  ;;  %v4202_v2 = vld [vmem:[%s5834_s1 + $0x784] ss:$12 sps:$4 sm:$0xff]   ;;  %v4197_v3 = vld [vmem:[%s5834_s1 + $0x600] ss:$12 sps:$4 sm:$0xff]  }
  0x6f   :  { %2816 = vmatpush2.bf16.msra.mxu0 %v4124_v4  ;;  %v4200_v4 = vld [vmem:[%s5834_s1 + $0x780] ss:$12 sps:$4 sm:$0xff]  }
  0x70   :  { %2857 = vmatpush2.bf16.msra.mxu1 %v4127_v5  ;;  %2817 = vmatprep.subr.bf16.mxu0 %v4132_v7  ;;  %v4205_v5 = vld [vmem:[%s5834_s1 + $0x76c] ss:$12 sps:$4 sm:$0xff]  }
  0x71   :  { %2858 = vmatprep.subr.bf16.mxu1 %v4135_v8  ;;  %v4208_v7 = vld [vmem:[%s5834_s1 + $0x8ec] ss:$12 sps:$4 sm:$0xff]   ;;  %v4203_v8 = vld [vmem:[%s5834_s1 + $0x768] ss:$12 sps:$4 sm:$0xff]  }
  0x73   :  { %2818 = vmatpush2.bf16.msra.mxu0 %v4130_v9  ;;  %v4206_v9 = vld [vmem:[%s5834_s1 + $0x8e8] ss:$12 sps:$4 sm:$0xff]  }
  0x74   :  { %2859 = vmatpush2.bf16.msra.mxu1 %v4133_v10  ;;  %2819 = vmatprep.subr.bf16.mxu0 %v4138_v11  ;;  %v4211_v10 = vld [vmem:[%s5834_s1 + $0x754] ss:$12 sps:$4 sm:$0xff]  }
  0x75   :  { %2860 = vmatprep.subr.bf16.mxu1 %v4141_v12  ;;  %v4214_v11 = vld [vmem:[%s5834_s1 + $0x8d4] ss:$12 sps:$4 sm:$0xff]   ;;  %v4209_v12 = vld [vmem:[%s5834_s1 + $0x750] ss:$12 sps:$4 sm:$0xff]  }
  0x77   :  { %2820 = vmatpush2.bf16.msra.mxu0 %v4136_v14  ;;  %v4212_v14 = vld [vmem:[%s5834_s1 + $0x8d0] ss:$12 sps:$4 sm:$0xff]  }
  0x78   :  { %2861 = vmatpush2.bf16.msra.mxu1 %v4139_v15  ;;  %2821 = vmatprep.subr.bf16.mxu0 %v4144_v16  ;;  %v4217_v15 = vld [vmem:[%s5834_s1 + $0x73c] ss:$12 sps:$4 sm:$0xff]  }
  0x79   :  { %2862 = vmatprep.subr.bf16.mxu1 %v4147_v19  ;;  %v4220_v16 = vld [vmem:[%s5834_s1 + $0x8bc] ss:$12 sps:$4 sm:$0xff]   ;;  %v4215_v19 = vld [vmem:[%s5834_s1 + $0x738] ss:$12 sps:$4 sm:$0xff]  }
  0x7b   :  { %2822 = vmatpush2.bf16.msra.mxu0 %v4142_v20  ;;  %v4218_v20 = vld [vmem:[%s5834_s1 + $0x8b8] ss:$12 sps:$4 sm:$0xff]  }
  0x7c   :  { %2863 = vmatpush2.bf16.msra.mxu1 %v4145_v21  ;;  %2823 = vmatprep.subr.bf16.mxu0 %v4150_v22  ;;  %v4223_v21 = vld [vmem:[%s5834_s1 + $0x724] ss:$12 sps:$4 sm:$0xff]  }
  0x7d   :  { %2864 = vmatprep.subr.bf16.mxu1 %v4153_v24  ;;  %v4226_v22 = vld [vmem:[%s5834_s1 + $0x8a4] ss:$12 sps:$4 sm:$0xff]   ;;  %v4221_v24 = vld [vmem:[%s5834_s1 + $0x720] ss:$12 sps:$4 sm:$0xff]  }
  0x7f   :  { %2824 = vmatpush2.bf16.msra.mxu0 %v4148_v25  ;;  %v4224_v25 = vld [vmem:[%s5834_s1 + $0x8a0] ss:$12 sps:$4 sm:$0xff]  }
  0x80   :  { %2865 = vmatpush2.bf16.msra.mxu1 %v4151_v27  ;;  %2875 = vmatprep.subr.bf16.mxu0 %v4157_v28  ;;  %v4229_v27 = vld [vmem:[%s5834_s1 + $0x70c] ss:$12 sps:$4 sm:$0xff]  }
  0x81   :  { %2916 = vmatprep.subr.bf16.mxu1 %v4160_v29  ;;  %v4232_v28 = vld [vmem:[%s5834_s1 + $0x88c] ss:$12 sps:$4 sm:$0xff]   ;;  %v4227_v29 = vld [vmem:[%s5834_s1 + $0x708] ss:$12 sps:$4 sm:$0xff]  }
  0x82   :  { %2826 = vmatmul.mubr.bf16.vlgmr.msra.gmra.mxu0 %v4945_v26 }
  0x83   :  { %2867 = vmatmul.mubr.bf16.vlgmr.msra.gmra.mxu1 %v4958_v6  ;;  %2876 = vmatpush1.bf16.msra.mxu0 %v4155_v30  ;;  %v4230_v30 = vld [vmem:[%s5834_s1 + $0x888] ss:$12 sps:$4 sm:$0xff]  }
  0x84   :  { %2917 = vmatpush1.bf16.msra.mxu1 %v4158_v31  ;;  %2877 = vmatprep.subr.bf16.mxu0 %v4163_v33  ;;  %v4235_v31 = vld [vmem:[%s5834_s1 + $0x6f4] ss:$12 sps:$4 sm:$0xff]  }
  0x85   :  { %2918 = vmatprep.subr.bf16.mxu1 %v4166_v34  ;;  %2907 = vmatprep.mubr.bf16.mxu0 %v4998_v41  ;;  %v4238_v33 = vld [vmem:[%s5834_s1 + $0x874] ss:$12 sps:$4 sm:$0xff]   ;;  %v4233_v34 = vld [vmem:[%s5834_s1 + $0x6f0] ss:$12 sps:$4 sm:$0xff]  }
  0x86   :  { %2948 = vmatprep.mubr.bf16.mxu1 %v5003_v43 }
  0x87   :  { %2878 = vmatpush1.bf16.msra.mxu0 %v4161_v37  ;;  %v4236_v37 = vld [vmem:[%s5834_s1 + $0x870] ss:$12 sps:$4 sm:$0xff]  }
  0x88   :  { %2919 = vmatpush1.bf16.msra.mxu1 %v4164_v38  ;;  %2879 = vmatprep.subr.bf16.mxu0 %v4169_v39  ;;  %v4241_v38 = vld [vmem:[%s5834_s1 + $0x6dc] ss:$12 sps:$4 sm:$0xff]  }
  0x89   :  { %2920 = vmatprep.subr.bf16.mxu1 %v4172_v40  ;;  %v4244_v39 = vld [vmem:[%s5834_s1 + $0x85c] ss:$12 sps:$4 sm:$0xff]   ;;  %v5156_v40 = vrot.slane %v598_v36, %v4656_v49 }
  0x8a   :  { %v4299_v36 = vld [vmem:[%s5834_s1 + $0xa68] ss:$12 sps:$4 sm:$0xff]  }
  0x8b   :  { %2880 = vmatpush1.bf16.msra.mxu0 %v4167_v44  ;;  %v4242_v44 = vld [vmem:[%s5834_s1 + $0x858] ss:$12 sps:$4 sm:$0xff]  }
  0x8c   :  { %2921 = vmatpush1.bf16.msra.mxu1 %v4170_v45  ;;  %2881 = vmatprep.subr.bf16.mxu0 %v4175_v46  ;;  %v4247_v45 = vld [vmem:[%s5834_s1 + $0x6c4] ss:$12 sps:$4 sm:$0xff]  }
  0x8d   :  { %2922 = vmatprep.subr.bf16.mxu1 %v4178_v47  ;;  %v4250_v46 = vld [vmem:[%s5834_s1 + $0x844] ss:$12 sps:$4 sm:$0xff]   ;;  %v4245_v47 = vld [vmem:[%s5834_s1 + $0x6c0] ss:$12 sps:$4 sm:$0xff]  }
  0x8f   :  { %2882 = vmatpush1.bf16.msra.mxu0 %v4173_v48  ;;  %v614_v48 = vcombine.high %v5156_v40, %v5156_v40 }
  0x90   :  { %2923 = vmatpush1.bf16.msra.mxu1 %v4176_v50  ;;  %2883 = vmatprep.subr.bf16.mxu0 %v4181_v51  ;;  %v4248_v50 = vld [vmem:[%s5834_s1 + $0x840] ss:$12 sps:$4 sm:$0xff]   ;;  %v5177_v51 = vrot.slane %v4979_v35, %v4656_v49  ;;  %v4254_v35 = vld [vmem:[%s5834_s1 + $0xb28] ss:$12 sps:$4 sm:$0xff]  }
  0x91   :  { %2924 = vmatprep.subr.bf16.mxu1 %v4184_v52  ;;  %v4253_v52 = vld [vmem:[%s5834_s1 + $0x9ac] ss:$12 sps:$4 sm:$0xff]  }
  0x93   :  { %2884 = vmatpush1.bf16.msra.mxu0 %v4179_v53  ;;  %v4256_v53 = vld [vmem:[%s5834_s1 + $0xb2c] ss:$12 sps:$4 sm:$0xff]  }
  0x94   :  { %2925 = vmatpush1.bf16.msra.mxu1 %v4182_v54  ;;  %2885 = vmatprep.subr.bf16.mxu0 %v4187_v55  ;;  %v4251_v54 = vld [vmem:[%s5834_s1 + $0x9a8] ss:$12 sps:$4 sm:$0xff]   ;;  %v5192_v55 = vrot.slane %v614_v48, %v4656_v49  ;;  %v4314_v48 = vld [vmem:[%s5834_s1 + $0xbb8] ss:$12 sps:$4 sm:$0xff]  }
  0x95   :  { %2926 = vmatprep.subr.bf16.mxu1 %v4190_v56  ;;  %v5196_v56 = vcombine.high %v5177_v51, %v5177_v51 }
  0x97   :  { %2886 = vmatpush1.bf16.msra.mxu0 %v4185_v57  ;;  %v534_v57 = vsub.s32 0, %v4638_v42 }
  0x98   :  { %2927 = vmatpush1.bf16.msra.mxu1 %v4188_v58  ;;  %2887 = vmatprep.subr.bf16.mxu0 %v4193_v59  ;;  %v538_v58 = vsub.s32 1, %v4638_v42  ;;  %v4259_v59 = vld [vmem:[%s5834_s1 + $0x994] ss:$12 sps:$4 sm:$0xff]  }
  0x99   :  { %2928 = vmatprep.subr.bf16.mxu1 %v4196_v61  ;;  %v4262_v61 = vld [vmem:[%s5834_s1 + $0xb14] ss:$12 sps:$4 sm:$0xff]  }
  0x9b   :  { %2888 = vmatpush1.bf16.msra.mxu0 %v4191_v62  ;;  %v4257_v62 = vld [vmem:[%s5834_s1 + $0x990] ss:$12 sps:$4 sm:$0xff]  }
  0x9c   :  { %2929 = vmatpush1.bf16.msra.mxu1 %v4194_v63  ;;  %2889 = vmatprep.subr.bf16.mxu0 %v4199_v1  ;;  %v5211_v63 = vcombine.high %v5192_v55, %v5192_v55  ;;  %v4260_v1 = vld [vmem:[%s5834_s1 + $0xb10] ss:$12 sps:$4 sm:$0xff]  }
  0x9d   :  { %2930 = vmatprep.subr.bf16.mxu1 %v4202_v2  ;;  %v4265_v2 = vld [vmem:[%s5834_s1 + $0x97c] ss:$12 sps:$4 sm:$0xff]  }
  0x9f   :  { %2890 = vmatpush1.bf16.msra.mxu0 %v4197_v3  ;;  %v4268_v3 = vld [vmem:[%s5834_s1 + $0xafc] ss:$12 sps:$4 sm:$0xff]  }
  0xa0   :  { %2931 = vmatpush1.bf16.msra.mxu1 %v4200_v4  ;;  %2891 = vmatprep.subr.bf16.mxu0 %v4205_v5  ;;  %v4263_v4 = vld [vmem:[%s5834_s1 + $0x978] ss:$12 sps:$4 sm:$0xff]  }
  0xa1   :  { %2932 = vmatprep.subr.bf16.mxu1 %v4208_v7  ;;  %v4266_v5 = vld [vmem:[%s5834_s1 + $0xaf8] ss:$12 sps:$4 sm:$0xff]  }
  0xa2   :  { %v4271_v7 = vld [vmem:[%s5834_s1 + $0x964] ss:$12 sps:$4 sm:$0xff]  }
  0xa3   :  { %2892 = vmatpush2.bf16.msra.mxu0 %v4203_v8  ;;  %v4274_v8 = vld [vmem:[%s5834_s1 + $0xae4] ss:$12 sps:$4 sm:$0xff]  }
  0xa4   :  { %2933 = vmatpush2.bf16.msra.mxu1 %v4206_v9  ;;  %2893 = vmatprep.subr.bf16.mxu0 %v4211_v10  ;;  %v4269_v9 = vld [vmem:[%s5834_s1 + $0x960] ss:$12 sps:$4 sm:$0xff]  }
  0xa5   :  { %2934 = vmatprep.subr.bf16.mxu1 %v4214_v11  ;;  %v4272_v10 = vld [vmem:[%s5834_s1 + $0xae0] ss:$12 sps:$4 sm:$0xff]  }
  0xa6   :  { %v4277_v11 = vld [vmem:[%s5834_s1 + $0x94c] ss:$12 sps:$4 sm:$0xff]  }
  0xa7   :  { %2894 = vmatpush2.bf16.msra.mxu0 %v4209_v12  ;;  %v4280_v12 = vld [vmem:[%s5834_s1 + $0xacc] ss:$12 sps:$4 sm:$0xff]  }
  0xa8   :  { %2935 = vmatpush2.bf16.msra.mxu1 %v4212_v14  ;;  %2895 = vmatprep.subr.bf16.mxu0 %v4217_v15  ;;  %v4275_v14 = vld [vmem:[%s5834_s1 + $0x948] ss:$12 sps:$4 sm:$0xff]  }
  0xa9   :  { %2936 = vmatprep.subr.bf16.mxu1 %v4220_v16  ;;  %v4278_v15 = vld [vmem:[%s5834_s1 + $0xac8] ss:$12 sps:$4 sm:$0xff]  }
  0xaa   :  { %v4283_v16 = vld [vmem:[%s5834_s1 + $0x934] ss:$12 sps:$4 sm:$0xff]  }
  0xab   :  { %2896 = vmatpush2.bf16.msra.mxu0 %v4215_v19  ;;  %v4286_v19 = vld [vmem:[%s5834_s1 + $0xab4] ss:$12 sps:$4 sm:$0xff]  }
  0xac   :  { %2937 = vmatpush2.bf16.msra.mxu1 %v4218_v20  ;;  %2897 = vmatprep.subr.bf16.mxu0 %v4223_v21  ;;  %v4281_v20 = vld [vmem:[%s5834_s1 + $0x930] ss:$12 sps:$4 sm:$0xff]  }
  0xad   :  { %2938 = vmatprep.subr.bf16.mxu1 %v4226_v22  ;;  %v4284_v21 = vld [vmem:[%s5834_s1 + $0xab0] ss:$12 sps:$4 sm:$0xff]  }
  0xae   :  { %v4289_v22 = vld [vmem:[%s5834_s1 + $0x91c] ss:$12 sps:$4 sm:$0xff]  }
  0xaf   :  { %2898 = vmatpush2.bf16.msra.mxu0 %v4221_v24  ;;  %v4292_v24 = vld [vmem:[%s5834_s1 + $0xa9c] ss:$12 sps:$4 sm:$0xff]  }
  0xb0   :  { %2939 = vmatpush2.bf16.msra.mxu1 %v4224_v25  ;;  %2899 = vmatprep.subr.bf16.mxu0 %v4229_v27  ;;  %v4287_v25 = vld [vmem:[%s5834_s1 + $0x918] ss:$12 sps:$4 sm:$0xff]  }
  0xb1   :  { %2940 = vmatprep.subr.bf16.mxu1 %v4232_v28  ;;  %v4290_v27 = vld [vmem:[%s5834_s1 + $0xa98] ss:$12 sps:$4 sm:$0xff]  }
  0xb2   :  { %v4295_v28 = vld [vmem:[%s5834_s1 + $0x904] ss:$12 sps:$4 sm:$0xff]  }
  0xb3   :  { %2900 = vmatpush2.bf16.msra.mxu0 %v4227_v29  ;;  %v4298_v29 = vld [vmem:[%s5834_s1 + $0xa84] ss:$12 sps:$4 sm:$0xff]  }
  0xb4   :  { %2941 = vmatpush2.bf16.msra.mxu1 %v4230_v30  ;;  %2901 = vmatprep.subr.bf16.mxu0 %v4235_v31  ;;  %v4293_v30 = vld [vmem:[%s5834_s1 + $0x900] ss:$12 sps:$4 sm:$0xff]  }
  0xb5   :  { %2942 = vmatprep.subr.bf16.mxu1 %v4238_v33  ;;  %v4296_v31 = vld [vmem:[%s5834_s1 + $0xa80] ss:$12 sps:$4 sm:$0xff]  }
  0xb6   :  { %v4301_v33 = vld [vmem:[%s5834_s1 + $0xa6c] ss:$12 sps:$4 sm:$0xff]  }
  0xb7   :  { %2902 = vmatpush2.bf16.msra.mxu0 %v4233_v34  ;;  %v4304_v34 = vld [vmem:[%s5834_s1 + $0xbec] ss:$12 sps:$4 sm:$0xff]  }
  0xb8   :  { %2943 = vmatpush2.bf16.msra.mxu1 %v4236_v37  ;;  %2903 = vmatprep.subr.bf16.mxu0 %v4241_v38  ;;  %v4302_v37 = vld [vmem:[%s5834_s1 + $0xbe8] ss:$12 sps:$4 sm:$0xff]  }
  0xb9   :  { %2944 = vmatprep.subr.bf16.mxu1 %v4244_v39  ;;  %v4307_v38 = vld [vmem:[%s5834_s1 + $0xa54] ss:$12 sps:$4 sm:$0xff]  }
  0xba   :  { %v4310_v39 = vld [vmem:[%s5834_s1 + $0xbd4] ss:$12 sps:$4 sm:$0xff]  }
  0xbb   :  { %2904 = vmatpush2.bf16.msra.mxu0 %v4239_v32  ;;  %v4305_v32 = vld [vmem:[%s5834_s1 + $0xa50] ss:$12 sps:$4 sm:$0xff]  }
  0xbc   :  { %2945 = vmatpush2.bf16.msra.mxu1 %v4242_v44  ;;  %2905 = vmatprep.subr.bf16.mxu0 %v4247_v45  ;;  %v4308_v44 = vld [vmem:[%s5834_s1 + $0xbd0] ss:$12 sps:$4 sm:$0xff]  }
  0xbd   :  { %2946 = vmatprep.subr.bf16.mxu1 %v4250_v46  ;;  %v4313_v45 = vld [vmem:[%s5834_s1 + $0xa3c] ss:$12 sps:$4 sm:$0xff]  }
  0xbe   :  { %v4316_v46 = vld [vmem:[%s5834_s1 + $0xbbc] ss:$12 sps:$4 sm:$0xff]  }
  0xbf   :  { %2906 = vmatpush2.bf16.msra.mxu0 %v4245_v47  ;;  %v4311_v47 = vld [vmem:[%s5834_s1 + $0xa38] ss:$12 sps:$4 sm:$0xff]  }
  0xc0   :  { %2947 = vmatpush2.bf16.msra.mxu1 %v4248_v50  ;;  %2957 = vmatprep.subr.bf16.mxu0 %v4253_v52  ;;  %v4319_v50 = vld [vmem:[%s5834_s1 + $0xa24] ss:$12 sps:$4 sm:$0xff]  }
  0xc1   :  { %2998 = vmatprep.subr.bf16.mxu1 %v4256_v53  ;;  %v4322_v52 = vld [vmem:[%s5834_s1 + $0xba4] ss:$12 sps:$4 sm:$0xff]   ;;  %v4317_v53 = vld [vmem:[%s5834_s1 + $0xa20] ss:$12 sps:$4 sm:$0xff]  }
  0xc2   :  { %2908 = vmatmul.mubr.bf16.vlgmr.msra.gmra.mxu0 %v5177_v51 }
  0xc3   :  { %2949 = vmatmul.mubr.bf16.vlgmr.msra.gmra.mxu1 %v5196_v56  ;;  %2958 = vmatpush1.bf16.msra.mxu0 %v4251_v54  ;;  %v4320_v54 = vld [vmem:[%s5834_s1 + $0xba0] ss:$12 sps:$4 sm:$0xff]  }
  0xc4   :  { %2999 = vmatpush1.bf16.msra.mxu1 %v4254_v35  ;;  %2959 = vmatprep.subr.bf16.mxu0 %v4259_v59  ;;  %v4325_v35 = vld [vmem:[%s5834_s1 + $0xa0c] ss:$12 sps:$4 sm:$0xff]  }
  0xc5   :  { %3000 = vmatprep.subr.bf16.mxu1 %v4262_v61  ;;  %2989 = vmatprep.mubr.bf16.mxu0 %v5192_v55  ;;  %v4328_v59 = vld [vmem:[%s5834_s1 + $0xb8c] ss:$12 sps:$4 sm:$0xff]   ;;  %v4323_v61 = vld [vmem:[%s5834_s1 + $0xa08] ss:$12 sps:$4 sm:$0xff]  }
  0xc6   :  { %3030 = vmatprep.mubr.bf16.mxu1 %v5211_v63 }
  0xc7   :  { %2960 = vmatpush1.bf16.msra.mxu0 %v4257_v62  ;;  %v4326_v62 = vld [vmem:[%s5834_s1 + $0xb88] ss:$12 sps:$4 sm:$0xff]  }
  0xc8   :  { %3001 = vmatpush1.bf16.msra.mxu1 %v4260_v1  ;;  %2961 = vmatprep.subr.bf16.mxu0 %v4265_v2  ;;  %v4331_v1 = vld [vmem:[%s5834_s1 + $0x9f4] ss:$12 sps:$4 sm:$0xff]  }
  0xc9   :  { %3002 = vmatprep.subr.bf16.mxu1 %v4268_v3  ;;  %v4334_v2 = vld [vmem:[%s5834_s1 + $0xb74] ss:$12 sps:$4 sm:$0xff]   ;;  %v4329_v3 = vld [vmem:[%s5834_s1 + $0x9f0] ss:$12 sps:$4 sm:$0xff]  }
  0xcb   :  { %2962 = vmatpush1.bf16.msra.mxu0 %v4263_v4  ;;  %v4332_v4 = vld [vmem:[%s5834_s1 + $0xb70] ss:$12 sps:$4 sm:$0xff]  }
  0xcc   :  { %3003 = vmatpush1.bf16.msra.mxu1 %v4266_v5  ;;  %2963 = vmatprep.subr.bf16.mxu0 %v4271_v7  ;;  %v4337_v5 = vld [vmem:[%s5834_s1 + $0x9dc] ss:$12 sps:$4 sm:$0xff]  }
  0xcd   :  { %3004 = vmatprep.subr.bf16.mxu1 %v4274_v8  ;;  %v4340_v7 = vld [vmem:[%s5834_s1 + $0xb5c] ss:$12 sps:$4 sm:$0xff]   ;;  %v4335_v8 = vld [vmem:[%s5834_s1 + $0x9d8] ss:$12 sps:$4 sm:$0xff]  }
  0xcf   :  { %2964 = vmatpush1.bf16.msra.mxu0 %v4269_v9  ;;  %v4338_v9 = vld [vmem:[%s5834_s1 + $0xb58] ss:$12 sps:$4 sm:$0xff]  }
  0xd0   :  { %3005 = vmatpush1.bf16.msra.mxu1 %v4272_v10  ;;  %2965 = vmatprep.subr.bf16.mxu0 %v4277_v11  ;;  %v4343_v10 = vld [vmem:[%s5834_s1 + $0x9c4] ss:$12 sps:$4 sm:$0xff]  }
  0xd1   :  { %3006 = vmatprep.subr.bf16.mxu1 %v4280_v12  ;;  %v4346_v11 = vld [vmem:[%s5834_s1 + $0xb44] ss:$12 sps:$4 sm:$0xff]   ;;  %v4341_v12 = vld [vmem:[%s5834_s1 + $0x9c0] ss:$12 sps:$4 sm:$0xff]  }
  0xd3   :  { %2966 = vmatpush1.bf16.msra.mxu0 %v4275_v14  ;;  %v4344_v14 = vld [vmem:[%s5834_s1 + $0xb40] ss:$12 sps:$4 sm:$0xff]  }
  0xd4   :  { %3007 = vmatpush1.bf16.msra.mxu1 %v4278_v15  ;;  %2967 = vmatprep.subr.bf16.mxu0 %v4283_v16  ;;  %v5391_v15 = vld [vmem:[%s5835_s2] sm:$0x7]  ;;  %v5395_v16 = vrot.slane %v5156_v40, %v4656_v49  ;;  %v4351_v40 = vld [vmem:[%s5834_s1 + $0x230] ss:$12 sps:$4 sm:$0xff]  }
  0xd5   :  { %3008 = vmatprep.subr.bf16.mxu1 %v4286_v19  ;;  %v4348_v19 = vld [vmem:[%s5834_s1 + $0x170] ss:$12 sps:$4 sm:$0xff]  }
  0xd6   :  { %v5408_v49 = vcombine.high %v5395_v16, %v5395_v16 }
  0xd7   :  { %2968 = vmatpush1.bf16.msra.mxu0 %v4281_v20  ;;  %v4349_v20 = vld [vmem:[%s5834_s1 + $0x2f0] ss:$12 sps:$4 sm:$0xff]  }
  0xd8   :  { %3009 = vmatpush1.bf16.msra.mxu1 %v4284_v21  ;;  %2969 = vmatprep.subr.bf16.mxu0 %v4289_v22  ;;  %v4350_v21 = vld [vmem:[%s5834_s1 + $0xb0] ss:$12 sps:$4 sm:$0xff]   ;;  %v535_v22 = vrot.slane %v5391_v15, %v534_v57 }
  0xd9   :  { %3010 = vmatprep.subr.bf16.mxu1 %v4292_v24  ;;  %v4352_v24 = vld [vmem:[%s5834_s1 + $0x158] ss:$12 sps:$4 sm:$0xff]  }
  0xdb   :  { %2970 = vmatpush1.bf16.msra.mxu0 %v4287_v25  ;;  %v4353_v25 = vld [vmem:[%s5834_s1 + $0x2d8] ss:$12 sps:$4 sm:$0xff]  }
  0xdc   :  { %3011 = vmatpush1.bf16.msra.mxu1 %v4290_v27  ;;  %2971 = vmatprep.subr.bf16.mxu0 %v4295_v28  ;;  %v539_v27 = vrot.slane %v5391_v15, %v538_v58  ;;  %v4354_v28 = vld [vmem:[%s5834_s1 + $0x98] ss:$12 sps:$4 sm:$0xff]   ;;  %v4356_v58 = vld [vmem:[%s5834_s1 + $0x140] ss:$12 sps:$4 sm:$0xff]  }
  0xdd   :  { %3012 = vmatprep.subr.bf16.mxu1 %v4298_v29 }
  0xdf   :  { %2972 = vmatpush1.bf16.msra.mxu0 %v4293_v30  ;;  %v4355_v30 = vld [vmem:[%s5834_s1 + $0x218] ss:$12 sps:$4 sm:$0xff]  }
  0xe0   :  { %3013 = vmatpush1.bf16.msra.mxu1 %v4296_v31  ;;  %2973 = vmatprep.subr.bf16.mxu0 %v4301_v33 }
  0xe1   :  { %3014 = vmatprep.subr.bf16.mxu1 %v4304_v34 }
  0xe3   :  { %2974 = vmatpush2.bf16.msra.mxu0 %v4299_v36  ;;  %v4357_v36 = vld [vmem:[%s5834_s1 + $0x2c0] ss:$12 sps:$4 sm:$0xff]  }
  0xe4   :  { %3015 = vmatpush2.bf16.msra.mxu1 %v4302_v37  ;;  %2975 = vmatprep.subr.bf16.mxu0 %v4307_v38 }
  0xe5   :  { %3016 = vmatprep.subr.bf16.mxu1 %v4310_v39  ;;  %v4358_v39 = vld [vmem:[%s5834_s1 + $0x80] ss:$12 sps:$4 sm:$0xff]  }
  0xe7   :  { %2976 = vmatpush2.bf16.msra.mxu0 %v4305_v32 }
  0xe8   :  { %3017 = vmatpush2.bf16.msra.mxu1 %v4308_v44  ;;  %2977 = vmatprep.subr.bf16.mxu0 %v4313_v45  ;;  %v4359_v45 = vld [vmem:[%s5834_s1 + $0x200] ss:$12 sps:$4 sm:$0xff]  }
  0xe9   :  { %3018 = vmatprep.subr.bf16.mxu1 %v4316_v46 }
  0xeb   :  { %2978 = vmatpush2.bf16.msra.mxu0 %v4311_v47  ;;  %v4360_v47 = vld [vmem:[%s5834_s1 + $0x128] ss:$12 sps:$4 sm:$0xff]  }
  0xec   :  { %3019 = vmatpush2.bf16.msra.mxu1 %v4314_v48  ;;  %2979 = vmatprep.subr.bf16.mxu0 %v4319_v50 }
  0xed   :  { %3020 = vmatprep.subr.bf16.mxu1 %v4322_v52  ;;  %v4363_v52 = vld [vmem:[%s5834_s1 + $0x1e8] ss:$12 sps:$4 sm:$0xff]  }
  0xef   :  { %2980 = vmatpush2.bf16.msra.mxu0 %v4317_v53  ;;  %v4364_v53 = vld [vmem:[%s5834_s1 + $0x110] ss:$12 sps:$4 sm:$0xff]  }
  0xf0   :  { %3021 = vmatpush2.bf16.msra.mxu1 %v4320_v54  ;;  %2981 = vmatprep.subr.bf16.mxu0 %v4325_v35  ;;  %v4365_v54 = vld [vmem:[%s5834_s1 + $0x290] ss:$12 sps:$4 sm:$0xff]  }
  0xf1   :  { %3022 = vmatprep.subr.bf16.mxu1 %v4328_v59  ;;  %v4366_v35 = vld [vmem:[%s5834_s1 + $0x50] ss:$12 sps:$4 sm:$0xff]  }
  0xf2   :  { %v4367_v59 = vld [vmem:[%s5834_s1 + $0x1d0] ss:$12 sps:$4 sm:$0xff]  }
  0xf3   :  { %2982 = vmatpush2.bf16.msra.mxu0 %v4323_v61  ;;  %v4368_v61 = vld [vmem:[%s5834_s1 + $0xf8] ss:$12 sps:$4 sm:$0xff]  }
  0xf4   :  { %3023 = vmatpush2.bf16.msra.mxu1 %v4326_v62  ;;  %2983 = vmatprep.subr.bf16.mxu0 %v4331_v1  ;;  %v4369_v62 = vld [vmem:[%s5834_s1 + $0x278] ss:$12 sps:$4 sm:$0xff]  }
  0xf5   :  { %3024 = vmatprep.subr.bf16.mxu1 %v4334_v2  ;;  %v4370_v1 = vld [vmem:[%s5834_s1 + $0x38] ss:$12 sps:$4 sm:$0xff]  }
  0xf6   :  { %v4371_v2 = vld [vmem:[%s5834_s1 + $0x1b8] ss:$12 sps:$4 sm:$0xff]  }
  0xf7   :  { %2984 = vmatpush2.bf16.msra.mxu0 %v4329_v3  ;;  %v4372_v3 = vld [vmem:[%s5834_s1 + $0xe0] ss:$12 sps:$4 sm:$0xff]  }
  0xf8   :  { %3025 = vmatpush2.bf16.msra.mxu1 %v4332_v4  ;;  %2985 = vmatprep.subr.bf16.mxu0 %v4337_v5  ;;  %v4373_v4 = vld [vmem:[%s5834_s1 + $0x260] ss:$12 sps:$4 sm:$0xff]  }
  0xf9   :  { %3026 = vmatprep.subr.bf16.mxu1 %v4340_v7  ;;  %v4374_v5 = vld [vmem:[%s5834_s1 + $0x20] ss:$12 sps:$4 sm:$0xff]  }
  0xfa   :  { %v4375_v7 = vld [vmem:[%s5834_s1 + $0x1a0] ss:$12 sps:$4 sm:$0xff]  }
  0xfb   :  { %2986 = vmatpush2.bf16.msra.mxu0 %v4335_v8  ;;  %v4376_v8 = vld [vmem:[%s5834_s1 + $0xc8] ss:$12 sps:$4 sm:$0xff]  }
  0xfc   :  { %3027 = vmatpush2.bf16.msra.mxu1 %v4338_v9  ;;  %2987 = vmatprep.subr.bf16.mxu0 %v4343_v10  ;;  %v4377_v9 = vld [vmem:[%s5834_s1 + $0x248] ss:$12 sps:$4 sm:$0xff]  }
  0xfd   :  { %3028 = vmatprep.subr.bf16.mxu1 %v4346_v11  ;;  %v4378_v10 = vld [vmem:[%s5834_s1 + $0x8] ss:$12 sps:$4 sm:$0xff]  }
  0xfe   :  { %v4379_v11 = vld [vmem:[%s5834_s1 + $0x188] ss:$12 sps:$4 sm:$0xff]  }
  0xff   :  { %2988 = vmatpush2.bf16.msra.mxu0 %v4341_v12  ;;  %v4380_v12 = vld [vmem:[%s5834_s1 + $0x470] ss:$12 sps:$4 sm:$0xff]  }
 0x100   :  { %3029 = vmatpush2.bf16.msra.mxu1 %v4344_v14  ;;  %3783 = vmatprep.subr.bf16.mxu0 %v4348_v19  ;;  %v4381_v14 = vld [vmem:[%s5834_s1 + $0x5f0] ss:$12 sps:$4 sm:$0xff]  }
 0x101   :  { %3805 = vmatprep.subr.bf16.mxu1 %v4349_v20  ;;  %v4382_v19 = vld [vmem:[%s5834_s1 + $0x3b0] ss:$12 sps:$4 sm:$0xff]  }
 0x102   :  { %v2745_v29 = vpop.f32.mrf.mxu0  ;;  %2990 = vmatmul.mubr.bf16.vlgmr.msra.gmra.mxu0 %v5395_v16  ;;  %v4383_v20 = vld [vmem:[%s5834_s1 + $0x530] ss:$12 sps:$4 sm:$0xff]  }
 0x103   :  { %v2786_v57 = vpop.f32.mrf.mxu1  ;;  %3031 = vmatmul.mubr.bf16.vlgmr.msra.gmra.mxu1 %v5408_v49  ;;  %v2746_v31 = vadd.f32 %v2745_v29, %v535_v22  ;;  %3784 = vmatpush3.bf16.msra.mxu0 %v4350_v21  ;;  %v4384_v21 = vld [vmem:[%s5834_s1 + $0x458] ss:$12 sps:$4 sm:$0xff]   ;;  %v4393_v29 = vld [vmem:[%s5834_s1 + $0x5a8] ss:$12 sps:$4 sm:$0xff]  }
 0x104   :  { %3806 = vmatpush3.bf16.msra.mxu1 %v4351_v40  ;;  %v2747_v33 = vpop.f32.mrf.mxu0  ;;  %3785 = vmatprep.subr.bf16.mxu0 %v4352_v24  ;;  %v4385_v40 = vld [vmem:[%s5834_s1 + $0x5d8] ss:$12 sps:$4 sm:$0xff]  }
 0x105   :  { %v2788_v34 = vpop.f32.mrf.mxu1  ;;  %3807 = vmatprep.subr.bf16.mxu1 %v4353_v25  ;;  %v5439_v37 = vadd.f32 %v2786_v57, %v2746_v31  ;;  %v2748_v38 = vadd.f32 %v2747_v33, %v539_v27  ;;  %3071 = vmatprep.mubr.bf16.mxu0 %v4684_v60  ;;  %v4361_v60 = vld [vmem:[%s5834_s1 + $0x2a8] ss:$12 sps:$4 sm:$0xff]   ;;  %v4386_v22 = vld [vmem:[%s5834_s1 + $0x398] ss:$12 sps:$4 sm:$0xff]   ;;  %v4388_v25 = vld [vmem:[%s5834_s1 + $0x440] ss:$12 sps:$4 sm:$0xff]  }
 0x106   :  { %3111 = vmatprep.mubr.bf16.mxu1 %v4697_v0  ;;  %v2749_v32 = vpop.f32.mrf.mxu0  ;;  %v4362_v0 = vld [vmem:[%s5834_s1 + $0x68] ss:$12 sps:$4 sm:$0xff]   ;;  %v4387_v24 = vld [vmem:[%s5834_s1 + $0x518] ss:$12 sps:$4 sm:$0xff]   ;;  %v4389_v27 = vld [vmem:[%s5834_s1 + $0x5c0] ss:$12 sps:$4 sm:$0xff]  }
 0x107   :  { %v2790_v44 = vpop.f32.mrf.mxu1  ;;  %v5449_v46 = vadd.f32 %v2788_v34, %v2748_v38  ;;  %3786 = vmatpush3.bf16.msra.mxu0 %v4354_v28  ;;  %v4392_v28 = vld [vmem:[%s5834_s1 + $0x428] ss:$12 sps:$4 sm:$0xff]  }
 0x108   :  { %3808 = vmatpush3.bf16.msra.mxu1 %v4355_v30  ;;  %v2750_v48 = vpop.f32.mrf.mxu0  ;;  %3787 = vmatprep.subr.bf16.mxu0 %v4356_v58 }
 0x109   :  { %v2791_v50 = vpop.f32.mrf.mxu1  ;;  %3809 = vmatprep.subr.bf16.mxu1 %v4357_v36 }
 0x10b   :  { %3788 = vmatpush3.bf16.msra.mxu0 %v4358_v39 }
 0x10c   :  { %3810 = vmatpush3.bf16.msra.mxu1 %v4359_v45  ;;  %3789 = vmatprep.subr.bf16.mxu0 %v4360_v47 }
 0x10d   :  { %3811 = vmatprep.subr.bf16.mxu1 %v4361_v60 }
 0x10f   :  { %3790 = vmatpush3.bf16.msra.mxu0 %v4362_v0 }
 0x110   :  { %3812 = vmatpush3.bf16.msra.mxu1 %v4363_v52  ;;  %3791 = vmatprep.subr.bf16.mxu0 %v4364_v53 }
 0x111   :  { %3813 = vmatprep.subr.bf16.mxu1 %v4365_v54 }
 0x113   :  { %3792 = vmatpush3.bf16.msra.mxu0 %v4366_v35 }
 0x114   :  { %3814 = vmatpush3.bf16.msra.mxu1 %v4367_v59  ;;  %3793 = vmatprep.subr.bf16.mxu0 %v4368_v61 }
 0x115   :  { %3815 = vmatprep.subr.bf16.mxu1 %v4369_v62 }
 0x117   :  { %3794 = vmatpush3.bf16.msra.mxu0 %v4370_v1 }
 0x118   :  { %3816 = vmatpush3.bf16.msra.mxu1 %v4371_v2  ;;  %3795 = vmatprep.subr.bf16.mxu0 %v4372_v3 }
 0x119   :  { %3817 = vmatprep.subr.bf16.mxu1 %v4373_v4 }
 0x11b   :  { %3796 = vmatpush3.bf16.msra.mxu0 %v4374_v5 }
 0x11c   :  { %3818 = vmatpush3.bf16.msra.mxu1 %v4375_v7  ;;  %3797 = vmatprep.subr.bf16.mxu0 %v4376_v8 }
 0x11d   :  { %3819 = vmatprep.subr.bf16.mxu1 %v4377_v9 }
 0x11f   :  { %3798 = vmatpush3.bf16.msra.mxu0 %v4378_v10 }
 0x120   :  { %3820 = vmatpush3.bf16.msra.mxu1 %v4379_v11  ;;  %3827 = vmatprep.subr.bf16.mxu0 %v4380_v12 }
 0x121   :  { %3849 = vmatprep.subr.bf16.mxu1 %v4381_v14 }
 0x122   :  { %3072 = vmatmul.mubr.bf16.vlgmr.msra.gmra.mxu0 %v4734_v13  ;;  %v4390_v13 = vld [vmem:[%s5834_s1 + $0x380] ss:$12 sps:$4 sm:$0xff]  }
 0x123   :  { %3112 = vmatmul.mubr.bf16.vlgmr.msra.gmra.mxu1 %v4750_v18  ;;  %3828 = vmatpush3.bf16.msra.mxu0 %v4382_v19  ;;  %v4391_v18 = vld [vmem:[%s5834_s1 + $0x500] ss:$12 sps:$4 sm:$0xff]  }
 0x124   :  { %3850 = vmatpush3.bf16.msra.mxu1 %v4383_v20  ;;  %3829 = vmatprep.subr.bf16.mxu0 %v4384_v21 }
 0x125   :  { %3851 = vmatprep.subr.bf16.mxu1 %v4385_v40  ;;  %3151 = vmatprep.mubr.bf16.mxu0 %v4746_v17 }
 0x126   :  { %3191 = vmatprep.mubr.bf16.mxu1 %v4766_v23 }
 0x127   :  { %3830 = vmatpush3.bf16.msra.mxu0 %v4386_v22 }
 0x128   :  { %3852 = vmatpush3.bf16.msra.mxu1 %v4387_v24  ;;  %3831 = vmatprep.subr.bf16.mxu0 %v4388_v25 }
 0x129   :  { %3853 = vmatprep.subr.bf16.mxu1 %v4389_v27 }
 0x12a   :  { %8 = vsyncpa [#allocation3], 0  ;;  %v4394_v17 = vld [vmem:[%s5834_s1 + $0x368] ss:$12 sps:$4 sm:$0xff]   ;;  %v4396_v57 = vld [vmem:[%s5834_s1 + $0x410] ss:$12 sps:$4 sm:$0xff]  }
 0x12b   :  { %3832 = vmatpush3.bf16.msra.mxu0 %v4390_v13  ;;  %v4395_v23 = vld [vmem:[%s5834_s1 + $0x4e8] ss:$12 sps:$4 sm:$0xff]   ;;  %v4397_v30 = vld [vmem:[%s5834_s1 + $0x590] ss:$12 sps:$4 sm:$0xff]   ;;  %v4400_v33 = vld [vmem:[%s5834_s1 + $0x3f8] ss:$12 sps:$4 sm:$0xff]  }
 0x12c   :  { %3854 = vmatpush3.bf16.msra.mxu1 %v4391_v18  ;;  %3833 = vmatprep.subr.bf16.mxu0 %v4392_v28  ;;  %v4398_v31 = vld [vmem:[%s5834_s1 + $0x350] ss:$12 sps:$4 sm:$0xff]   ;;  %v4401_v34 = vld [vmem:[%s5834_s1 + $0x578] ss:$12 sps:$4 sm:$0xff]   ;;  %v4404_v39 = vld [vmem:[%s5834_s1 + $0x3e0] ss:$12 sps:$4 sm:$0xff]  }
 0x12d   :  { %3855 = vmatprep.subr.bf16.mxu1 %v4393_v29  ;;  %v4399_v58 = vld [vmem:[%s5834_s1 + $0x4d0] ss:$12 sps:$4 sm:$0xff]   ;;  %v4402_v36 = vld [vmem:[%s5834_s1 + $0x338] ss:$12 sps:$4 sm:$0xff]   ;;  %v4405_v32 = vld [vmem:[%s5834_s1 + $0x560] ss:$12 sps:$4 sm:$0xff]  }
 0x12e   :  { %v4403_v38 = vld [vmem:[%s5834_s1 + $0x4b8] ss:$12 sps:$4 sm:$0xff]   ;;  %v4406_v44 = vld [vmem:[%s5834_s1 + $0x320] ss:$12 sps:$4 sm:$0xff]   ;;  %v4408_v47 = vld [vmem:[%s5834_s1 + $0x3c8] ss:$12 sps:$4 sm:$0xff]  }
 0x12f   :  { %3834 = vmatpush3.bf16.msra.mxu0 %v4394_v17  ;;  %v4407_v45 = vld [vmem:[%s5834_s1 + $0x4a0] ss:$12 sps:$4 sm:$0xff]   ;;  %v4409_v48 = vld [vmem:[%s5834_s1 + $0x548] ss:$12 sps:$4 sm:$0xff]   ;;  %v4412_v0 = vld [vmem:[%s5834_s1 + $0x770] ss:$12 sps:$4 sm:$0xff]  }
 0x130   :  { %3856 = vmatpush3.bf16.msra.mxu1 %v4395_v23  ;;  %3835 = vmatprep.subr.bf16.mxu0 %v4396_v57  ;;  %v4410_v50 = vld [vmem:[%s5834_s1 + $0x308] ss:$12 sps:$4 sm:$0xff]   ;;  %v4413_v52 = vld [vmem:[%s5834_s1 + $0x8f0] ss:$12 sps:$4 sm:$0xff]   ;;  %v4416_v35 = vld [vmem:[%s5834_s1 + $0x758] ss:$12 sps:$4 sm:$0xff]  }
 0x131   :  { %3857 = vmatprep.subr.bf16.mxu1 %v4397_v30  ;;  %v4411_v60 = vld [vmem:[%s5834_s1 + $0x488] ss:$12 sps:$4 sm:$0xff]   ;;  %v4414_v53 = vld [vmem:[%s5834_s1 + $0x6b0] ss:$12 sps:$4 sm:$0xff]   ;;  %v4417_v59 = vld [vmem:[%s5834_s1 + $0x8d8] ss:$12 sps:$4 sm:$0xff]  }
 0x132   :  { %v4415_v54 = vld [vmem:[%s5834_s1 + $0x830] ss:$12 sps:$4 sm:$0xff]   ;;  %v4418_v2 = vld [vmem:[%s5834_s1 + $0x698] ss:$12 sps:$4 sm:$0xff]   ;;  %v4422_v11 = vld [vmem:[%s5834_s1 + $0x680] ss:$12 sps:$4 sm:$0xff]  }
 0x133   :  { %3836 = vmatpush3.bf16.msra.mxu0 %v4398_v31  ;;  %v4419_v3 = vld [vmem:[%s5834_s1 + $0x818] ss:$12 sps:$4 sm:$0xff]   ;;  %v4423_v12 = vld [vmem:[%s5834_s1 + $0x800] ss:$12 sps:$4 sm:$0xff]   ;;  %v4426_v19 = vld [vmem:[%s5834_s1 + $0x668] ss:$12 sps:$4 sm:$0xff]  }
 0x134   :  { %3858 = vmatpush3.bf16.msra.mxu1 %v4399_v58  ;;  %3837 = vmatprep.subr.bf16.mxu0 %v4400_v33  ;;  %v4427_v20 = vld [vmem:[%s5834_s1 + $0x7e8] ss:$12 sps:$4 sm:$0xff]   ;;  %v4428_v21 = vld [vmem:[%s5834_s1 + $0x710] ss:$12 sps:$4 sm:$0xff]   ;;  %v4432_v25 = vld [vmem:[%s5834_s1 + $0x6f8] ss:$12 sps:$4 sm:$0xff]  }
 0x135   :  { %3859 = vmatprep.subr.bf16.mxu1 %v4401_v34  ;;  %v4429_v40 = vld [vmem:[%s5834_s1 + $0x890] ss:$12 sps:$4 sm:$0xff]   ;;  %v4433_v27 = vld [vmem:[%s5834_s1 + $0x878] ss:$12 sps:$4 sm:$0xff]   ;;  %v4436_v28 = vld [vmem:[%s5834_s1 + $0x6e0] ss:$12 sps:$4 sm:$0xff]  }
 0x136   :  { %v4430_v22 = vld [vmem:[%s5834_s1 + $0x650] ss:$12 sps:$4 sm:$0xff]   ;;  %v4434_v13 = vld [vmem:[%s5834_s1 + $0x638] ss:$12 sps:$4 sm:$0xff]   ;;  %v4437_v29 = vld [vmem:[%s5834_s1 + $0x860] ss:$12 sps:$4 sm:$0xff]  }
 0x137   :  { %3838 = vmatpush3.bf16.msra.mxu0 %v4402_v36  ;;  %v4431_v24 = vld [vmem:[%s5834_s1 + $0x7d0] ss:$12 sps:$4 sm:$0xff]   ;;  %v4435_v18 = vld [vmem:[%s5834_s1 + $0x7b8] ss:$12 sps:$4 sm:$0xff]   ;;  %v4438_v17 = vld [vmem:[%s5834_s1 + $0x620] ss:$12 sps:$4 sm:$0xff]  }
 0x138   :  { %3860 = vmatpush3.bf16.msra.mxu1 %v4403_v38  ;;  %3839 = vmatprep.subr.bf16.mxu0 %v4404_v39  ;;  %v4439_v23 = vld [vmem:[%s5834_s1 + $0x7a0] ss:$12 sps:$4 sm:$0xff]   ;;  %v4440_v57 = vld [vmem:[%s5834_s1 + $0x6c8] ss:$12 sps:$4 sm:$0xff]   ;;  %v4444_v33 = vld [vmem:[%s5834_s1 + $0xa70] ss:$12 sps:$4 sm:$0xff]  }
 0x139   :  { %3861 = vmatprep.subr.bf16.mxu1 %v4405_v32  ;;  %v4441_v30 = vld [vmem:[%s5834_s1 + $0x848] ss:$12 sps:$4 sm:$0xff]   ;;  %v4445_v34 = vld [vmem:[%s5834_s1 + $0xbf0] ss:$12 sps:$4 sm:$0xff]   ;;  %v4448_v39 = vld [vmem:[%s5834_s1 + $0xa58] ss:$12 sps:$4 sm:$0xff]  }
 0x13a   :  { %v4442_v31 = vld [vmem:[%s5834_s1 + $0x608] ss:$12 sps:$4 sm:$0xff]   ;;  %v4446_v36 = vld [vmem:[%s5834_s1 + $0x9b0] ss:$12 sps:$4 sm:$0xff]   ;;  %v4449_v32 = vld [vmem:[%s5834_s1 + $0xbd8] ss:$12 sps:$4 sm:$0xff]  }
 0x13b   :  { %3840 = vmatpush3.bf16.msra.mxu0 %v4406_v44  ;;  %v4443_v58 = vld [vmem:[%s5834_s1 + $0x788] ss:$12 sps:$4 sm:$0xff]   ;;  %v4447_v38 = vld [vmem:[%s5834_s1 + $0xb30] ss:$12 sps:$4 sm:$0xff]   ;;  %v4450_v44 = vld [vmem:[%s5834_s1 + $0x998] ss:$12 sps:$4 sm:$0xff]  }
 0x13c   :  { %3862 = vmatpush3.bf16.msra.mxu1 %v4407_v45  ;;  %3841 = vmatprep.subr.bf16.mxu0 %v4408_v47  ;;  %v4451_v45 = vld [vmem:[%s5834_s1 + $0xb18] ss:$12 sps:$4 sm:$0xff]   ;;  %v4452_v47 = vld [vmem:[%s5834_s1 + $0xa40] ss:$12 sps:$4 sm:$0xff]   ;;  %vm3379_vm0 = vcmask 1041408   ;;  %vm3380_vm1 = vcmask 1043458  }
 0x13d   :  { %3863 = vmatprep.subr.bf16.mxu1 %v4409_v48  ;;  %v4455_v48 = vld [vmem:[%s5834_s1 + $0xb00] ss:$12 sps:$4 sm:$0xff]   ;;  %vm3381_vm2 = vmor %vm3380_vm1, %vm3379_vm0  ;;  %vm3382_vm3 = vcmask 5124  }
 0x13e   :  { %vm3383_vm4 = vmor %vm3382_vm3, %vm3381_vm2 }
 0x13f   :  { %3842 = vmatpush3.bf16.msra.mxu0 %v4410_v50  ;;  %v4456_v50 = vld [vmem:[%s5834_s1 + $0xa28] ss:$12 sps:$4 sm:$0xff]  }
 0x140   :  { %3864 = vmatpush3.bf16.msra.mxu1 %v4411_v60  ;;  %3871 = vmatprep.subr.bf16.mxu0 %v4412_v0  ;;  %v4459_v60 = vld [vmem:[%s5834_s1 + $0xae8] ss:$12 sps:$4 sm:$0xff]   ;;  %v4460_v0 = vld [vmem:[%s5834_s1 + $0xa10] ss:$12 sps:$4 sm:$0xff]  }
 0x141   :  { %3893 = vmatprep.subr.bf16.mxu1 %v4413_v52  ;;  %v4461_v52 = vld [vmem:[%s5834_s1 + $0xb90] ss:$12 sps:$4 sm:$0xff]  }
 0x142   :  { %v2827_v61 = vpop.f32.mrf.mxu0  ;;  %3152 = vmatmul.mubr.bf16.vlgmr.msra.gmra.mxu0 %v4945_v26  ;;  %v4420_v26 = vld [vmem:[%s5834_s1 + $0x740] ss:$12 sps:$4 sm:$0xff]  }
 0x143   :  { %v2868_v62 = vpop.f32.mrf.mxu1  ;;  %3192 = vmatmul.mubr.bf16.vlgmr.msra.gmra.mxu1 %v4958_v6  ;;  %v2828_v1 = vadd.f32 %v2827_v61, %v5439_v37  ;;  %3872 = vmatpush3.bf16.msra.mxu0 %v4414_v53  ;;  %v4421_v6 = vld [vmem:[%s5834_s1 + $0x8c0] ss:$12 sps:$4 sm:$0xff]   ;;  %v4462_v53 = vld [vmem:[%s5834_s1 + $0x950] ss:$12 sps:$4 sm:$0xff]   ;;  %v4466_v61 = vld [vmem:[%s5834_s1 + $0x938] ss:$12 sps:$4 sm:$0xff]  }
 0x144   :  { %3894 = vmatpush3.bf16.msra.mxu1 %v4415_v54  ;;  %v2829_v4 = vpop.f32.mrf.mxu0  ;;  %3873 = vmatprep.subr.bf16.mxu0 %v4416_v35  ;;  %v4463_v54 = vld [vmem:[%s5834_s1 + $0xad0] ss:$12 sps:$4 sm:$0xff]   ;;  %v4464_v35 = vld [vmem:[%s5834_s1 + $0x9f8] ss:$12 sps:$4 sm:$0xff]  }
 0x145   :  { %v2870_v5 = vpop.f32.mrf.mxu1  ;;  %3895 = vmatprep.subr.bf16.mxu1 %v4417_v59  ;;  %v5644_v37 = vadd.f32 %v2868_v62, %v2828_v1  ;;  %v2830_v7 = vadd.f32 %v2829_v4, %v5449_v46  ;;  %3231 = vmatprep.mubr.bf16.mxu0 %v4998_v41  ;;  %v4424_v41 = vld [vmem:[%s5834_s1 + $0x728] ss:$12 sps:$4 sm:$0xff]   ;;  %v4465_v59 = vld [vmem:[%s5834_s1 + $0xb78] ss:$12 sps:$4 sm:$0xff]   ;;  %v4468_v1 = vld [vmem:[%s5834_s1 + $0x9e0] ss:$12 sps:$4 sm:$0xff]  }
 0x146   :  { %3271 = vmatprep.mubr.bf16.mxu1 %v5003_v43  ;;  %v2831_v8 = vpop.f32.mrf.mxu0  ;;  %v4425_v43 = vld [vmem:[%s5834_s1 + $0x8a8] ss:$12 sps:$4 sm:$0xff]   ;;  %v4467_v62 = vld [vmem:[%s5834_s1 + $0xab8] ss:$12 sps:$4 sm:$0xff]   ;;  %v4471_v4 = vld [vmem:[%s5834_s1 + $0xaa0] ss:$12 sps:$4 sm:$0xff]  }
 0x147   :  { %v2872_v9 = vpop.f32.mrf.mxu1  ;;  %v5649_v10 = vadd.f32 %v2870_v5, %v2830_v7  ;;  %3874 = vmatpush3.bf16.msra.mxu0 %v4418_v2  ;;  %v4469_v2 = vld [vmem:[%s5834_s1 + $0xb60] ss:$12 sps:$4 sm:$0xff]   ;;  %v4472_v5 = vld [vmem:[%s5834_s1 + $0x9c8] ss:$12 sps:$4 sm:$0xff]  }
 0x148   :  { %3896 = vmatpush3.bf16.msra.mxu1 %v4419_v3  ;;  %v2832_v14 = vpop.f32.mrf.mxu0  ;;  %3875 = vmatprep.subr.bf16.mxu0 %v4420_v26  ;;  %v4470_v3 = vld [vmem:[%s5834_s1 + $0x920] ss:$12 sps:$4 sm:$0xff]   ;;  %v4473_v26 = vld [vmem:[%s5834_s1 + $0xb48] ss:$12 sps:$4 sm:$0xff]  }
 0x149   :  { %v2873_v46 = vpop.f32.mrf.mxu1  ;;  %3897 = vmatprep.subr.bf16.mxu1 %v4421_v6  ;;  %v4474_v6 = vld [vmem:[%s5834_s1 + $0x908] ss:$12 sps:$4 sm:$0xff]  }
 0x14a   :  { %v4475_v7 = vld [vmem:[%s5834_s1 + $0xa88] ss:$12 sps:$4 sm:$0xff]  }
 0x14b   :  { %3876 = vmatpush3.bf16.msra.mxu0 %v4422_v11 }
 0x14c   :  { %3898 = vmatpush3.bf16.msra.mxu1 %v4423_v12  ;;  %3877 = vmatprep.subr.bf16.mxu0 %v4424_v41 }
 0x14d   :  { %3899 = vmatprep.subr.bf16.mxu1 %v4425_v43 }
 0x14f   :  { %3878 = vmatpush3.bf16.msra.mxu0 %v4426_v19 }
 0x150   :  { %3900 = vmatpush3.bf16.msra.mxu1 %v4427_v20  ;;  %3879 = vmatprep.subr.bf16.mxu0 %v4428_v21 }
 0x151   :  { %3901 = vmatprep.subr.bf16.mxu1 %v4429_v40 }
 0x153   :  { %3880 = vmatpush3.bf16.msra.mxu0 %v4430_v22 }
 0x154   :  { %3902 = vmatpush3.bf16.msra.mxu1 %v4431_v24  ;;  %3881 = vmatprep.subr.bf16.mxu0 %v4432_v25 }
 0x155   :  { %3903 = vmatprep.subr.bf16.mxu1 %v4433_v27 }
 0x157   :  { %3882 = vmatpush3.bf16.msra.mxu0 %v4434_v13 }
 0x158   :  { %3904 = vmatpush3.bf16.msra.mxu1 %v4435_v18  ;;  %3883 = vmatprep.subr.bf16.mxu0 %v4436_v28 }
 0x159   :  { %3905 = vmatprep.subr.bf16.mxu1 %v4437_v29 }
 0x15b   :  { %3884 = vmatpush3.bf16.msra.mxu0 %v4438_v17 }
 0x15c   :  { %3906 = vmatpush3.bf16.msra.mxu1 %v4439_v23  ;;  %3885 = vmatprep.subr.bf16.mxu0 %v4440_v57  ;;  %v542_v23 = vsub.s32 2, %v4638_v42 }
 0x15d   :  { %3907 = vmatprep.subr.bf16.mxu1 %v4441_v30 }
 0x15f   :  { %3886 = vmatpush3.bf16.msra.mxu0 %v4442_v31  ;;  %v543_v31 = vrot.slane %v5391_v15, %v542_v23 }
 0x160   :  { %3908 = vmatpush3.bf16.msra.mxu1 %v4443_v58  ;;  %3915 = vmatprep.subr.bf16.mxu0 %v4444_v33 }
 0x161   :  { %3937 = vmatprep.subr.bf16.mxu1 %v4445_v34 }
 0x162   :  { %3232 = vmatmul.mubr.bf16.vlgmr.msra.gmra.mxu0 %v5177_v51  ;;  %v4453_v51 = vld [vmem:[%s5834_s1 + $0xbc0] ss:$12 sps:$4 sm:$0xff]  }
 0x163   :  { %3272 = vmatmul.mubr.bf16.vlgmr.msra.gmra.mxu1 %v5196_v56  ;;  %3916 = vmatpush3.bf16.msra.mxu0 %v4446_v36  ;;  %v4454_v56 = vld [vmem:[%s5834_s1 + $0x980] ss:$12 sps:$4 sm:$0xff]  }
 0x164   :  { %3938 = vmatpush3.bf16.msra.mxu1 %v4447_v38  ;;  %3917 = vmatprep.subr.bf16.mxu0 %v4448_v39 }
 0x165   :  { %3939 = vmatprep.subr.bf16.mxu1 %v4449_v32  ;;  %3311 = vmatprep.mubr.bf16.mxu0 %v5192_v55  ;;  %v4457_v55 = vld [vmem:[%s5834_s1 + $0xba8] ss:$12 sps:$4 sm:$0xff]  }
 0x166   :  { %3351 = vmatprep.mubr.bf16.mxu1 %v5211_v63  ;;  %v4458_v63 = vld [vmem:[%s5834_s1 + $0x968] ss:$12 sps:$4 sm:$0xff]   ;;  %s4500_s1 = smov [#allocation2]  }
 0x167   :  { %3918 = vmatpush3.bf16.msra.mxu0 %v4450_v44  ;;  %s3391_s30 = sshll.u32 %s4500_s1, 4  ;;  %s3392_s30 = int_to_ptr.vmem [resolvable:$true] %s3391_s30 }
 0x168   :  { %3940 = vmatpush3.bf16.msra.mxu1 %v4451_v45  ;;  %3919 = vmatprep.subr.bf16.mxu0 %v4452_v47  ;;  %s4476_s4 = scalar_lea.vmem %s3392_s30, 96  ;;  %p4481_p1 = scmp.lt.s32.totalorder %s3392_s30, %s3392_s30 }
 0x169   :  { %3941 = vmatprep.subr.bf16.mxu1 %v4453_v51  ;;  %p4477_p0 = scmp.ne.s32.totalorder %s3392_s30, %s4476_s4  ;;  %p4482_p2 = scmp.lt.s32.totalorder %s4476_s4, %s4476_s4 }
 0x16b   :  { %3920 = vmatpush3.bf16.msra.mxu0 %v4454_v56  ;;  %p4483_p3 = por %p4482_p2, %p4481_p1 }
 0x16c   :  { %3942 = vmatpush3.bf16.msra.mxu1 %v4455_v48  ;;  %3921 = vmatprep.subr.bf16.mxu0 %v4456_v50 }
 0x16d   :  { %3943 = vmatprep.subr.bf16.mxu1 %v4457_v55  ;;  %p4484_p4 = pnand %p4483_p3, %p4477_p0 }
 0x16f   :  { %3922 = vmatpush3.bf16.msra.mxu0 %v4458_v63 }
 0x170   :  { %3944 = vmatpush3.bf16.msra.mxu1 %v4459_v60  ;;  %3923 = vmatprep.subr.bf16.mxu0 %v4460_v0 }
 0x171   :  { %3945 = vmatprep.subr.bf16.mxu1 %v4461_v52 }
 0x173   :  { %3924 = vmatpush3.bf16.msra.mxu0 %v4462_v53 }
 0x174   :  { %3946 = vmatpush3.bf16.msra.mxu1 %v4463_v54  ;;  %3925 = vmatprep.subr.bf16.mxu0 %v4464_v35 }
 0x175   :  { %3947 = vmatprep.subr.bf16.mxu1 %v4465_v59 }
 0x177   :  { %3926 = vmatpush3.bf16.msra.mxu0 %v4466_v61 }
 0x178   :  { %3948 = vmatpush3.bf16.msra.mxu1 %v4467_v62  ;;  %3927 = vmatprep.subr.bf16.mxu0 %v4468_v1 }
 0x179   :  { %3949 = vmatprep.subr.bf16.mxu1 %v4469_v2 }
 0x17b   :  { %3928 = vmatpush3.bf16.msra.mxu0 %v4470_v3 }
 0x17c   :  { %3950 = vmatpush3.bf16.msra.mxu1 %v4471_v4  ;;  %3929 = vmatprep.subr.bf16.mxu0 %v4472_v5  ;;  %v4499_v5 = vmov 1983009808  }
 0x17d   :  { %3951 = vmatprep.subr.bf16.mxu1 %v4473_v26  ;;  %v3364_v26 = vunpack.c.l.s4 %v4499_v5 }
 0x17f   :  { %3930 = vmatpush3.bf16.msra.mxu0 %v4474_v6 }
 0x180   :  { %3952 = vmatpush3.bf16.msra.mxu1 %v4475_v7 }
 0x182   :  { %v2909_v8 = vpop.f32.mrf.mxu0  ;;  %3312 = vmatmul.mubr.bf16.vlgmr.msra.gmra.mxu0 %v5395_v16 }
 0x183   :  { %v2950_v9 = vpop.f32.mrf.mxu1  ;;  %3352 = vmatmul.mubr.bf16.vlgmr.msra.gmra.mxu1 %v5408_v49  ;;  %v2910_v11 = vadd.f32 %v2909_v8, %v5644_v37 }
 0x184   :  { %v2911_v12 = vpop.f32.mrf.mxu0 }
 0x185   :  { %v2952_v14 = vpop.f32.mrf.mxu1  ;;  %v2951_v46 = vadd.f32 %v2950_v9, %v2910_v11  ;;  %v2912_v41 = vadd.f32 %v2911_v12, %v5649_v10  ;;  %v3365_v12 = vunpack.c.0.s8 %v3364_v26 }
 0x186   :  { %v2913_v43 = vpop.f32.mrf.mxu0 }
 0x187   :  { %v2954_v19 = vpop.f32.mrf.mxu1  ;;  %v2953_v20 = vadd.f32 %v2952_v14, %v2912_v41 }
 0x188   :  { %v2914_v21 = vpop.f32.mrf.mxu0 }
 0x189   :  { %v2955_v40 = vpop.f32.mrf.mxu1  ;;  %v3368_v21 = vsub.s32 %v3365_v12, %v4638_v42 }
 0x1c2   :  { %v2991_v22 = vpop.f32.mrf.mxu0 }
 0x1c3   :  { %v3032_v24 = vpop.f32.mrf.mxu1  ;;  %v2992_v25 = vadd.f32 %v2991_v22, %v2951_v46 }
 0x1c4   :  { %v2993_v27 = vpop.f32.mrf.mxu0 }
 0x1c5   :  { %v3034_v13 = vpop.f32.mrf.mxu1  ;;  %v5821_v16 = vadd.f32 %v3032_v24, %v2992_v25  ;;  %v2994_v49 = vadd.f32 %v2993_v27, %v2953_v20 }
 0x1c6   :  { %v2995_v18 = vpop.f32.mrf.mxu0 }
 0x1c7   :  { %v3036_v37 = vpop.f32.mrf.mxu1  ;;  %v5823_v28 = vadd.f32 %v3034_v13, %v2994_v49 }
 0x1c8   :  { %v2996_v29 = vpop.f32.mrf.mxu0 }
 0x1c9   :  { %v3037_v17 = vpop.f32.mrf.mxu1  ;;  %v3362_v10 = vcombine.low %v5821_v16, %v5823_v28 }
 0x1cb   :  { %v3369_v13 = vrot.slane %v3362_v10, %v3368_v21 }
 0x1e2   :  { %v3799_v57 = vpop.f32.mrf.mxu0 }
 0x1e3   :  { %v3821_v30 = vpop.f32.mrf.mxu1 }
 0x1e4   :  { %v3800_v58 = vpop.f32.mrf.mxu0 }
 0x1e5   :  { %v3822_v33 = vpop.f32.mrf.mxu1  ;;  %v3801_v34 = vadd.f32 %v3800_v58, %v3799_v57 }
 0x1e6   :  { %v3823_v36 = vadd.f32 %v3822_v33, %v3821_v30  ;;  %v3802_v38 = vpop.f32.mrf.mxu0 }
 0x1e7   :  { %v3824_v39 = vpop.f32.mrf.mxu1  ;;  %v3074_v32 = vadd.f32 %v3801_v34, %v543_v31 }
 0x1e8   :  { %v3803_v44 = vpop.f32.mrf.mxu0 }
 0x1e9   :  { %v3825_v45 = vpop.f32.mrf.mxu1  ;;  %v3114_v47 = vadd.f32 %v3823_v36, %v3074_v32 }
 0x202   :  { %v3843_v51 = vpop.f32.mrf.mxu0 }
 0x203   :  { %v3865_v56 = vpop.f32.mrf.mxu1 }
 0x204   :  { %v3844_v48 = vpop.f32.mrf.mxu0 }
 0x205   :  { %v3866_v50 = vpop.f32.mrf.mxu1  ;;  %v3845_v1 = vadd.f32 %v3844_v48, %v3843_v51 }
 0x206   :  { %v3846_v55 = vpop.f32.mrf.mxu0  ;;  %v3867_v3 = vadd.f32 %v3866_v50, %v3865_v56 }
 0x207   :  { %v3868_v63 = vpop.f32.mrf.mxu1  ;;  %v3154_v2 = vadd.f32 %v3845_v1, %v3114_v47 }
 0x208   :  { %v3847_v60 = vpop.f32.mrf.mxu0 }
 0x209   :  { %v3869_v0 = vpop.f32.mrf.mxu1  ;;  %v3194_v6 = vadd.f32 %v3867_v3, %v3154_v2 }
 0x222   :  { %v3887_v52 = vpop.f32.mrf.mxu0 }
 0x223   :  { %v3909_v15 = vpop.f32.mrf.mxu1 }
 0x224   :  { %v3888_v53 = vpop.f32.mrf.mxu0 }
 0x225   :  { %v3910_v54 = vpop.f32.mrf.mxu1  ;;  %v3889_v4 = vadd.f32 %v3888_v53, %v3887_v52 }
 0x226   :  { %v3890_v35 = vpop.f32.mrf.mxu0  ;;  %v3911_v8 = vadd.f32 %v3910_v54, %v3909_v15 }
 0x227   :  { %v3912_v59 = vpop.f32.mrf.mxu1  ;;  %v3234_v7 = vadd.f32 %v3889_v4, %v3194_v6 }
 0x228   :  { %v3891_v61 = vpop.f32.mrf.mxu0 }
 0x229   :  { %v3913_v62 = vpop.f32.mrf.mxu1  ;;  %v3274_v41 = vadd.f32 %v3911_v8, %v3234_v7 }
 0x242   :  { %v3931_v9 = vpop.f32.mrf.mxu0 }
 0x243   :  { %v3953_v11 = vpop.f32.mrf.mxu1 }
 0x244   :  { %v3932_v14 = vpop.f32.mrf.mxu0 }
 0x245   :  { %v3954_v46 = vpop.f32.mrf.mxu1  ;;  %v3933_v43 = vadd.f32 %v3932_v14, %v3931_v9 }
 0x246   :  { %v3934_v19 = vpop.f32.mrf.mxu0  ;;  %v3955_v22 = vadd.f32 %v3954_v46, %v3953_v11 }
 0x247   :  { %v3956_v20 = vpop.f32.mrf.mxu1  ;;  %v3314_v40 = vadd.f32 %v3933_v43, %v3274_v41 }
 0x248   :  { %v3935_v24 = vpop.f32.mrf.mxu0 }
 0x249   :  { %v3957_v25 = vpop.f32.mrf.mxu1  ;;  %v3354_v27 = vadd.f32 %v3955_v22, %v3314_v40 }
 0x24b   :  { %v3376_v16 = vrot.slane %v3354_v27, %v3368_v21 }
 0x24d   :  { %v3377_v49 = vcombine.low %v3369_v13, %v3376_v16 }
 0x24f   :  { %3384 = vst.msk [vmem:[#allocation2] sm:$0x3f] %vm3383_vm4, %v3377_v49 }
 0x250   :  { %4487 = shalt.err (!%p4484_p4)
}
 0x251   :  { %3394 = dma.vmem_to_hbm [thread:$0]  %s3392_s30, 96, %s5836_s3, [#allocation3]  }
 0x252   :  { %4496 = dma.done.wait [#allocation3], 96  }
 0x253   :  { %4497 = vsyncadd [#allocation3], 4294967200 }
 0x254   :  { %3398 = vsyncpa [#allocation3], 1 }

</bundles_post_ra>
